<compile_context>
chip_gen: v7x
topology: tpu7x:2x2x1
jax: 0.10.0
libtpu: 0.0.40
codegen_flags: <defaults>
</compile_context>

<pallas_src>
import functools

import jax
import jax.numpy as jnp
from jax.experimental import pallas as pl
from jax.experimental.pallas import tpu as pltpu

_H1, _H2 = 512, 256
_H3 = 128          # hidden-3 width padded 64 -> 128 (lane-dense)
_OUT_PAD = 128     # logits padded to a full 128-lane block
_NEG_INF = -1e30   # bias for padded logit columns (exp underflows to 0)


def _mlp_kernel(x_ref, w1_ref, b1_ref, w2_ref, b2_ref,
                w3_ref, b3_ref, w4_ref, b4_ref, o_ref):
    # layer_input: (TB, d_in) @ (d_in, 512) + b   (bf16 operands, f32 accumulate)
    x = x_ref[...].astype(jnp.bfloat16)
    h = jnp.dot(x, w1_ref[...], preferred_element_type=jnp.float32) + b1_ref[...]
    # dropout1 (p=0.6): eval-mode semantics => identity
    # TODO(synk): training-mode dropout (pltpu.prng mask + 1/(1-p) scaling) not implemented.
    h = jnp.maximum(h, 0.0)                                        # ReLU

    # layer_hidden1: 512 -> 256
    h = jnp.dot(h.astype(jnp.bfloat16), w2_ref[...],
                preferred_element_type=jnp.float32) + b2_ref[...]
    h = jnp.maximum(h, 0.0)

    # layer_hidden2: 256 -> 64 (padded to 128; padded cols stay exactly 0 after ReLU)
    h = jnp.dot(h.astype(jnp.bfloat16), w3_ref[...],
                preferred_element_type=jnp.float32) + b3_ref[...]
    h = jnp.maximum(h, 0.0)

    # layer_out: 64(pad 128) -> dim_out (padded to 128, padded bias = -1e30)
    logits = jnp.dot(h.astype(jnp.bfloat16), w4_ref[...],
                     preferred_element_type=jnp.float32) + b4_ref[...]

    # softmax over dim=1; padded columns vanish (exp(-huge - m) == 0)
    m = jnp.max(logits, axis=1, keepdims=True)
    e = jnp.exp(logits - m)
    denom = jnp.sum(e, axis=1, keepdims=True)
    o_ref[...] = e * pl.reciprocal(denom, approx=True)


def _round_up(n, m):
    return ((n + m - 1) // m) * m


@functools.partial(jax.jit, static_argnames=("dim_out",))
def mlp_forward(x_nchw, params, dim_out):
    """x_nchw: (B, C, H, W) float32. params: dict from init_mlp_params."""
    b = x_nchw.shape[0]
    d_in = x_nchw.shape[1] * x_nchw.shape[-2] * x_nchw.shape[-1]
    x2d = x_nchw.reshape(b, d_in).astype(jnp.float32)   # == x.view(-1, C*H*W)

    # Batch tile: MXU-friendly, fits VMEM comfortably on v5e/v6e/v7x.
    tb = min(512, _round_up(b, 8))
    b_pad = _round_up(b, tb)
    if b_pad != b:
        x2d = jnp.pad(x2d, ((0, b_pad - b), (0, 0)))     # pad rows sliced off below
    grid = (b_pad // tb,)

    const = lambda i: (0, 0)   # weights / biases: same block every step -> resident
    in_specs = [
        pl.BlockSpec((tb, d_in), lambda i: (i, 0)),
        pl.BlockSpec((d_in, _H1), const), pl.BlockSpec((1, _H1), const),
        pl.BlockSpec((_H1, _H2), const), pl.BlockSpec((1, _H2), const),
        pl.BlockSpec((_H2, _H3), const), pl.BlockSpec((1, _H3), const),
        pl.BlockSpec((_H3, _OUT_PAD), const), pl.BlockSpec((1, _OUT_PAD), const),
    ]
    out_specs = pl.BlockSpec((tb, _OUT_PAD), lambda i: (i, 0))
    out_shape = jax.ShapeDtypeStruct((b_pad, _OUT_PAD), jnp.float32)

    mm_terms = d_in * _H1 + _H1 * _H2 + _H2 * _H3 + _H3 * _OUT_PAD
    weight_bytes = 2 * mm_terms                              # bf16 weights
    bias_bytes = 4 * (_H1 + _H2 + _H3 + _OUT_PAD)
    cost = pl.CostEstimate(
        flops=2 * b_pad * mm_terms,
        transcendentals=b_pad * (_OUT_PAD + 1),              # exp + reciprocal
        bytes_accessed=weight_bytes + bias_bytes + 4 * b_pad * (d_in + _OUT_PAD),
    )

    out = pl.pallas_call(
        _mlp_kernel,
        out_shape=out_shape,
        grid=grid,
        in_specs=in_specs,
        out_specs=out_specs,
        compiler_params=pltpu.CompilerParams(
            dimension_semantics=("parallel",)),
        cost_estimate=cost,
    )(x2d,
      params["w1"], params["b1"],
      params["w2"], params["b2"],
      params["w3"], params["b3"],
      params["w4"], params["b4"])

    if b_pad == b and dim_out == _OUT_PAD:
        return out
    return out[:b, :dim_out]


def init_mlp_params(key, dim_in, dim_out):
    """nn.Linear-style init (U(-1/sqrt(fan_in), 1/sqrt(fan_in))).

    Weights pre-transposed to (in, out) and stored bf16 (kernel accumulates in
    f32); biases f32 with shape (1, out).  Layer-3 output is zero-padded
    64 -> 128 and layer-4 is padded to (128, 128); padded logit columns get
    bias = -1e30 so the in-kernel softmax ignores them exactly.
    """
    assert dim_out <= _OUT_PAD
    dims = [(dim_in, 512), (512, 256), (256, 64), (64, dim_out)]
    params = {}
    for i, (fan_in, fan_out) in enumerate(dims, start=1):
        key, kw, kb = jax.random.split(key, 3)
        bound = 1.0 / (fan_in ** 0.5)
        params[f"w{i}"] = jax.random.uniform(
            kw, (fan_in, fan_out), jnp.float32, minval=-bound, maxval=bound)
        params[f"b{i}"] = jax.random.uniform(
            kb, (1, fan_out), jnp.float32, minval=-bound, maxval=bound)

    # layer_hidden2 (256 -> 64): pad output lanes to 128 with zeros (ReLU keeps 0).
    params["w3"] = jnp.pad(params["w3"], ((0, 0), (0, _H3 - 64)))
    params["b3"] = jnp.pad(params["b3"], ((0, 0), (0, _H3 - 64)))
    # layer_out: pad K 64 -> 128 (zero rows) and N dim_out -> 128 (zero cols,
    # bias -1e30 so padded logits never survive the softmax).
    params["w4"] = jnp.pad(params["w4"], ((0, _H3 - 64), (0, _OUT_PAD - dim_out)))
    params["b4"] = jnp.pad(params["b4"], ((0, 0), (0, _OUT_PAD - dim_out)),
                           constant_values=_NEG_INF)

    for i in range(1, 5):                      # MXU-native bf16 weights
        params[f"w{i}"] = params[f"w{i}"].astype(jnp.bfloat16)
    return params


if __name__ == "__main__":
    key = jax.random.PRNGKey(0)
    k_x, k_p = jax.random.split(key)

    # Small shapes consistent with forward: B=2, C=4, H=W=16 -> dim_in=1024
    B, C, H, W = 2, 4, 16, 16
    dim_in = C * H * W
    dim_out = 10

    x = jax.random.normal(k_x, (B, C, H, W), dtype=jnp.float32)
    params = init_mlp_params(k_p, dim_in, dim_out)

    out = mlp_forward(x, params, dim_out)
    out = jax.block_until_ready(out)

    # sanity: output shape, finiteness, and softmax rows sum to ~1
    assert out.shape == (B, dim_out)
    assert bool(jnp.all(jnp.isfinite(out)))
    assert jnp.allclose(jnp.sum(out, axis=1), 1.0, atol=1e-2)
    print("KERNEL_OK")
</pallas_src>

<mosaic_0001>
module attributes {stable_mosaic.version = 11 : i64} {
  func.func @_mlp_kernel(%arg0: i32, %arg1: memref<8x1024xf32, #tpu.memory_space<vmem>>, %arg2: memref<1024x512xbf16, #tpu.memory_space<vmem>>, %arg3: memref<1x512xf32, #tpu.memory_space<vmem>>, %arg4: memref<512x256xbf16, #tpu.memory_space<vmem>>, %arg5: memref<1x256xf32, #tpu.memory_space<vmem>>, %arg6: memref<256x128xbf16, #tpu.memory_space<vmem>>, %arg7: memref<1x128xf32, #tpu.memory_space<vmem>>, %arg8: memref<128x128xbf16, #tpu.memory_space<vmem>>, %arg9: memref<1x128xf32, #tpu.memory_space<vmem>>, %arg10: memref<8x128xf32, #tpu.memory_space<vmem>>) attributes {dimension_semantics = [#tpu.dimension_semantics<parallel>], iteration_bounds = array<i64: 1>, scalar_prefetch = 0 : i64, scratch_operands = 0 : i64, tpu.core_type = #tpu.core_type<tc>, window_params = [{transform_indices = @transform_0, window_bounds = array<i64: 8, 1024>}, {pipeline_mode = #tpu.pipeline_mode<synchronous>, transform_indices = @transform_1, window_bounds = array<i64: 1024, 512>}, {pipeline_mode = #tpu.pipeline_mode<synchronous>, transform_indices = @transform_2, window_bounds = array<i64: 1, 512>}, {pipeline_mode = #tpu.pipeline_mode<synchronous>, transform_indices = @transform_3, window_bounds = array<i64: 512, 256>}, {pipeline_mode = #tpu.pipeline_mode<synchronous>, transform_indices = @transform_4, window_bounds = array<i64: 1, 256>}, {pipeline_mode = #tpu.pipeline_mode<synchronous>, transform_indices = @transform_5, window_bounds = array<i64: 256, 128>}, {pipeline_mode = #tpu.pipeline_mode<synchronous>, transform_indices = @transform_6, window_bounds = array<i64: 1, 128>}, {pipeline_mode = #tpu.pipeline_mode<synchronous>, transform_indices = @transform_7, window_bounds = array<i64: 128, 128>}, {pipeline_mode = #tpu.pipeline_mode<synchronous>, transform_indices = @transform_8, window_bounds = array<i64: 1, 128>}, {transform_indices = @transform_9, window_bounds = array<i64: 8, 128>}]} {
    %c0 = arith.constant 0 : index
    %c0_0 = arith.constant 0 : index
    %0 = vector.load %arg1[%c0, %c0_0] : memref<8x1024xf32, #tpu.memory_space<vmem>>, vector<8x1024xf32>
    %1 = arith.truncf %0 : vector<8x1024xf32> to vector<8x1024xbf16>
    %c0_1 = arith.constant 0 : index
    %c0_2 = arith.constant 0 : index
    %2 = vector.load %arg2[%c0_1, %c0_2] : memref<1024x512xbf16, #tpu.memory_space<vmem>>, vector<1024x512xbf16>
    %cst = arith.constant dense<0.000000e+00> : vector<8x512xf32>
    %3 = tpu.matmul %1, %2, %cst {dimension_numbers = #tpu.dot_dimension_numbers<[1], [0], [0], [1], [0, 0, 1, 1], [], []>} : vector<8x1024xbf16>, vector<1024x512xbf16>, vector<8x512xf32> -> vector<8x512xf32>
    %c0_3 = arith.constant 0 : index
    %c0_4 = arith.constant 0 : index
    %4 = vector.load %arg3[%c0_3, %c0_4] : memref<1x512xf32, #tpu.memory_space<vmem>>, vector<1x512xf32>
    %5 = vector.broadcast %4 : vector<1x512xf32> to vector<8x512xf32>
    %6 = arith.addf %3, %5 : vector<8x512xf32>
    %cst_5 = arith.constant 0.000000e+00 : f32
    %7 = vector.broadcast %cst_5 : f32 to vector<8x512xf32>
    %8 = arith.maximumf %6, %7 : vector<8x512xf32>
    %9 = arith.truncf %8 : vector<8x512xf32> to vector<8x512xbf16>
    %c0_6 = arith.constant 0 : index
    %c0_7 = arith.constant 0 : index
    %10 = vector.load %arg4[%c0_6, %c0_7] : memref<512x256xbf16, #tpu.memory_space<vmem>>, vector<512x256xbf16>
    %cst_8 = arith.constant dense<0.000000e+00> : vector<8x256xf32>
    %11 = tpu.matmul %9, %10, %cst_8 {dimension_numbers = #tpu.dot_dimension_numbers<[1], [0], [0], [1], [0, 0, 1, 1], [], []>} : vector<8x512xbf16>, vector<512x256xbf16>, vector<8x256xf32> -> vector<8x256xf32>
    %c0_9 = arith.constant 0 : index
    %c0_10 = arith.constant 0 : index
    %12 = vector.load %arg5[%c0_9, %c0_10] : memref<1x256xf32, #tpu.memory_space<vmem>>, vector<1x256xf32>
    %13 = vector.broadcast %12 : vector<1x256xf32> to vector<8x256xf32>
    %14 = arith.addf %11, %13 : vector<8x256xf32>
    %cst_11 = arith.constant 0.000000e+00 : f32
    %15 = vector.broadcast %cst_11 : f32 to vector<8x256xf32>
    %16 = arith.maximumf %14, %15 : vector<8x256xf32>
    %17 = arith.truncf %16 : vector<8x256xf32> to vector<8x256xbf16>
    %c0_12 = arith.constant 0 : index
    %c0_13 = arith.constant 0 : index
    %18 = vector.load %arg6[%c0_12, %c0_13] : memref<256x128xbf16, #tpu.memory_space<vmem>>, vector<256x128xbf16>
    %cst_14 = arith.constant dense<0.000000e+00> : vector<8x128xf32>
    %19 = tpu.matmul %17, %18, %cst_14 {dimension_numbers = #tpu.dot_dimension_numbers<[1], [0], [0], [1], [0, 0, 1, 1], [], []>} : vector<8x256xbf16>, vector<256x128xbf16>, vector<8x128xf32> -> vector<8x128xf32>
    %c0_15 = arith.constant 0 : index
    %c0_16 = arith.constant 0 : index
    %20 = vector.load %arg7[%c0_15, %c0_16] : memref<1x128xf32, #tpu.memory_space<vmem>>, vector<1x128xf32>
    %21 = vector.broadcast %20 : vector<1x128xf32> to vector<8x128xf32>
    %22 = arith.addf %19, %21 : vector<8x128xf32>
    %cst_17 = arith.constant 0.000000e+00 : f32
    %23 = vector.broadcast %cst_17 : f32 to vector<8x128xf32>
    %24 = arith.maximumf %22, %23 : vector<8x128xf32>
    %25 = arith.truncf %24 : vector<8x128xf32> to vector<8x128xbf16>
    %c0_18 = arith.constant 0 : index
    %c0_19 = arith.constant 0 : index
    %26 = vector.load %arg8[%c0_18, %c0_19] : memref<128x128xbf16, #tpu.memory_space<vmem>>, vector<128x128xbf16>
    %cst_20 = arith.constant dense<0.000000e+00> : vector<8x128xf32>
    %27 = tpu.matmul %25, %26, %cst_20 {dimension_numbers = #tpu.dot_dimension_numbers<[1], [0], [0], [1], [0, 0, 1, 1], [], []>} : vector<8x128xbf16>, vector<128x128xbf16>, vector<8x128xf32> -> vector<8x128xf32>
    %c0_21 = arith.constant 0 : index
    %c0_22 = arith.constant 0 : index
    %28 = vector.load %arg9[%c0_21, %c0_22] : memref<1x128xf32, #tpu.memory_space<vmem>>, vector<1x128xf32>
    %29 = vector.broadcast %28 : vector<1x128xf32> to vector<8x128xf32>
    %30 = arith.addf %27, %29 : vector<8x128xf32>
    %cst_23 = arith.constant dense<0xFF800000> : vector<8xf32>
    %31 = vector.multi_reduction <maximumf>, %30, %cst_23 [1] : vector<8x128xf32> to vector<8xf32>
    %32 = vector.shape_cast %31 : vector<8xf32> to vector<8x1xf32>
    %33 = vector.broadcast %32 : vector<8x1xf32> to vector<8x128xf32>
    %34 = arith.subf %30, %33 : vector<8x128xf32>
    %35 = math.exp %34 : vector<8x128xf32>
    %cst_24 = arith.constant dense<0.000000e+00> : vector<8xf32>
    %36 = vector.multi_reduction <add>, %35, %cst_24 [1] : vector<8x128xf32> to vector<8xf32>
    %37 = vector.shape_cast %36 : vector<8xf32> to vector<8x1xf32>
    %38 = tpu.reciprocal %37 {approx = true} : vector<8x1xf32> -> vector<8x1xf32>
    %39 = vector.broadcast %38 : vector<8x1xf32> to vector<8x128xf32>
    %40 = arith.mulf %35, %39 : vector<8x128xf32>
    %c0_25 = arith.constant 0 : index
    %c0_26 = arith.constant 0 : index
    %41 = vector.load %arg10[%c0_25, %c0_26] : memref<8x128xf32, #tpu.memory_space<vmem>>, vector<8x128xf32>
    tpu.vector_store %arg10[%c0_25, %c0_26], %40 {strides = array<i32>} : memref<8x128xf32, #tpu.memory_space<vmem>>, vector<8x128xf32>,
    return
  }
  func.func @transform_0(%arg0: i32) -> (i32, i32) {
    %c0_i32 = arith.constant 0 : i32
    %c0_i32_0 = arith.constant 0 : i32
    return %arg0, %c0_i32 : i32, i32
  }
  func.func @transform_1(%arg0: i32) -> (i32, i32) {
    %c0_i32 = arith.constant 0 : i32
    %c0_i32_0 = arith.constant 0 : i32
    %c0_i32_1 = arith.constant 0 : i32
    return %c0_i32, %c0_i32_0 : i32, i32
  }
  func.func @transform_2(%arg0: i32) -> (i32, i32) {
    %c0_i32 = arith.constant 0 : i32
    %c0_i32_0 = arith.constant 0 : i32
    %c0_i32_1 = arith.constant 0 : i32
    return %c0_i32, %c0_i32_0 : i32, i32
  }
  func.func @transform_3(%arg0: i32) -> (i32, i32) {
    %c0_i32 = arith.constant 0 : i32
    %c0_i32_0 = arith.constant 0 : i32
    %c0_i32_1 = arith.constant 0 : i32
    return %c0_i32, %c0_i32_0 : i32, i32
  }
  func.func @transform_4(%arg0: i32) -> (i32, i32) {
    %c0_i32 = arith.constant 0 : i32
    %c0_i32_0 = arith.constant 0 : i32
    %c0_i32_1 = arith.constant 0 : i32
    return %c0_i32, %c0_i32_0 : i32, i32
  }
  func.func @transform_5(%arg0: i32) -> (i32, i32) {
    %c0_i32 = arith.constant 0 : i32
    %c0_i32_0 = arith.constant 0 : i32
    %c0_i32_1 = arith.constant 0 : i32
    return %c0_i32, %c0_i32_0 : i32, i32
  }
  func.func @transform_6(%arg0: i32) -> (i32, i32) {
    %c0_i32 = arith.constant 0 : i32
    %c0_i32_0 = arith.constant 0 : i32
    %c0_i32_1 = arith.constant 0 : i32
    return %c0_i32, %c0_i32_0 : i32, i32
  }
  func.func @transform_7(%arg0: i32) -> (i32, i32) {
    %c0_i32 = arith.constant 0 : i32
    %c0_i32_0 = arith.constant 0 : i32
    %c0_i32_1 = arith.constant 0 : i32
    return %c0_i32, %c0_i32_0 : i32, i32
  }
  func.func @transform_8(%arg0: i32) -> (i32, i32) {
    %c0_i32 = arith.constant 0 : i32
    %c0_i32_0 = arith.constant 0 : i32
    %c0_i32_1 = arith.constant 0 : i32
    return %c0_i32, %c0_i32_0 : i32, i32
  }
  func.func @transform_9(%arg0: i32) -> (i32, i32) {
    %c0_i32 = arith.constant 0 : i32
    %c0_i32_0 = arith.constant 0 : i32
    return %arg0, %c0_i32 : i32, i32
  }
}

</mosaic_0001>

<bundles_post_ra>
// kernel: mlp_forward.1
= control target key start
LH: loop header
LB: loop body
LE: loop exit
PB: predicated region body
PF: predicated region fallthrough
CT: control target
= control target key end

     0   :  { %14 = vsyncpa [#allocation3], 0  ;;  %s3968_s0 = inlined_call_operand.vmem [shape: f32[8,1024], index: 0, kind: input, shape index: {}]   ;;  %s3969_s1 = inlined_call_operand.hbm [shape: bf16[1024,512], index: 1, kind: input, shape index: {}]   ;;  %s3970_s2 = inlined_call_operand.vmem [shape: f32[1,512], index: 2, kind: input, shape index: {}]   ;;  %s3971_s3 = inlined_call_operand.hbm [shape: bf16[512,256], index: 3, kind: input, shape index: {}]   ;;  %s3972_s4 = inlined_call_operand.vmem [shape: f32[1,256], index: 4, kind: input, shape index: {}]   ;;  %s3973_s5 = inlined_call_operand.vmem [shape: bf16[256,128], index: 5, kind: input, shape index: {}]   ;;  %s3974_s6 = inlined_call_operand.vmem [shape: f32[1,128], index: 6, kind: input, shape index: {}]   ;;  %s3975_s7 = inlined_call_operand.vmem [shape: bf16[128,128], index: 7, kind: input, shape index: {}]   ;;  %s3976_s8 = inlined_call_operand.vmem [shape: f32[1,128], index: 8, kind: input, shape index: {}]   ;;  %s3977_s9 = inlined_call_operand.vmem [shape: f32[8,128], index: 9, kind: output, shape index: {}]  }
   0x1   :  { %15 = vsyncpa [#allocation5], 0  ;;  %s3752_s30 = smov [#allocation2]   ;;  %s3704_s13 = scalar_lea.hbm %s3969_s1, 32768 }
   0x2   :  { %s23_s10 = sshll.u32 %s3752_s30, 4  ;;  %p3705_p0 = scmp.ne.s32.totalorder %s3969_s1, %s3704_s13  ;;  %s24_s10 = int_to_ptr.vmem [resolvable:$true] %s23_s10 }
   0x3   :  { %p3708_p1 = scmp.lt.u32.totalorder %s3704_s13, %s3969_s1 }
   0x5   :  { %p3710_p2 = pnand %p3708_p1, %p3705_p0 }
   0x7   :  { %3713 = shalt.err (!%p3710_p2)
}
   0x8   :  { %s3714_s18 = scalar_lea.vmem %s24_s10, 32768  ;;  %p3719_p4 = scmp.lt.s32.totalorder %s24_s10, %s24_s10 }
   0x9   :  { %p3715_p3 = scmp.ne.s32.totalorder %s24_s10, %s3714_s18  ;;  %p3720_p5 = scmp.lt.s32.totalorder %s3714_s18, %s3714_s18 }
   0xb   :  { %p3721_p6 = por %p3720_p5, %p3719_p4 }
   0xd   :  { %p3722_p7 = pnand %p3721_p6, %p3715_p3 }
   0xf   :  { %3725 = shalt.err (!%p3722_p7)
}
  0x10   :  { %s3753_s19 = smov 256   ;;  %s3754_s20 = smov 16  }
  0x11   :  { %29 = dma.hbm_to_vmem [thread:$0]  %s3969_s1, 32768, %s24_s10, [#allocation3], %s3753_s19, %s3753_s19, %s3754_s20  }
  0x12   :  { %s3755_s23 = smov [#allocation4]   ;;  %s3726_s27 = scalar_lea.hbm %s3971_s3, 8192 }
  0x13   :  { %s37_s24 = sshll.u32 %s3755_s23, 4  ;;  %p3727_p8 = scmp.ne.s32.totalorder %s3971_s3, %s3726_s27  ;;  %s38_s24 = int_to_ptr.vmem [resolvable:$true] %s37_s24 }
  0x14   :  { %p3730_p9 = scmp.lt.u32.totalorder %s3726_s27, %s3971_s3 }
  0x16   :  { %p3732_p10 = pnand %p3730_p9, %p3727_p8 }
  0x18   :  { %3735 = shalt.err (!%p3732_p10)
}
  0x19   :  { %s3736_s12 = scalar_lea.vmem %s38_s24, 8192  ;;  %p3741_p12 = scmp.lt.s32.totalorder %s38_s24, %s38_s24 }
  0x1a   :  { %p3737_p11 = scmp.ne.s32.totalorder %s38_s24, %s3736_s12  ;;  %p3742_p13 = scmp.lt.s32.totalorder %s3736_s12, %s3736_s12 }
  0x1c   :  { %p3743_p0 = por %p3742_p13, %p3741_p12 }
  0x1e   :  { %p3744_p1 = pnand %p3743_p0, %p3737_p11 }
  0x20   :  { %3747 = shalt.err (!%p3744_p1)
}
  0x21   :  { %s3756_s1 = smov 128   ;;  %s3757_s10 = smov 8  }
  0x22   :  { %43 = dma.hbm_to_vmem [thread:$0]  %s3971_s3, 8192, %s38_s24, [#allocation5], %s3756_s1, %s3756_s1, %s3757_s10  }
  0x23   :  { %3748 = dma.done.wait [#allocation3], 32768  }
  0x24   :  { %3749 = vsyncadd [#allocation3], 4294934528 }
  0x25   :  { %3750 = dma.done.wait [#allocation5], 8192  }
  0x26   :  { %3751 = vsyncadd [#allocation5], 4294959104  ;;  %v3196_v0 = vld [vmem:[#allocation2 + $0x4] ss:$16 sps:$4 sm:$0xff]   ;;  %v3198_v1 = vld [vmem:[#allocation2 + $0xc] ss:$16 sps:$4 sm:$0xff]  }
  0x27   :  { %1635 = vmatprep.subr.bf16.mxu0 %v3196_v0  ;;  %v3200_v2 = vld [vmem:[#allocation2] ss:$16 sps:$4 sm:$0xff]   ;;  %v3201_v3 = vld [vmem:[#allocation2 + $0x8] ss:$16 sps:$4 sm:$0xff]   ;;  %1799 = vmatprep.subr.bf16.mxu1 %v3198_v1  ;;  %v3202_v4 = vld [vmem:[#allocation2 + $0x24] ss:$16 sps:$4 sm:$0xff]  }
  0x28   :  { %1636 = vmatpush1.bf16.msra.mxu0 %v3200_v2  ;;  %1800 = vmatpush1.bf16.msra.mxu1 %v3201_v3  ;;  %v3204_v5 = vld [vmem:[#allocation2 + $0x2c] ss:$16 sps:$4 sm:$0xff]   ;;  %v3206_v6 = vld [vmem:[#allocation2 + $0x20] ss:$16 sps:$4 sm:$0xff]   ;;  %v3207_v7 = vld [vmem:[#allocation2 + $0x28] ss:$16 sps:$4 sm:$0xff]  }
  0x29   :  { %1637 = vmatprep.subr.bf16.mxu0 %v3202_v4  ;;  %1801 = vmatprep.subr.bf16.mxu1 %v3204_v5  ;;  %v3208_v8 = vld [vmem:[#allocation2 + $0x44] ss:$16 sps:$4 sm:$0xff]   ;;  %v3210_v9 = vld [vmem:[#allocation2 + $0x4c] ss:$16 sps:$4 sm:$0xff]   ;;  %v3212_v10 = vld [vmem:[#allocation2 + $0x40] ss:$16 sps:$4 sm:$0xff]  }
  0x2a   :  { %v3213_v11 = vld [vmem:[#allocation2 + $0x48] ss:$16 sps:$4 sm:$0xff]   ;;  %v3214_v12 = vld [vmem:[#allocation2 + $0x64] ss:$16 sps:$4 sm:$0xff]   ;;  %v3216_v13 = vld [vmem:[#allocation2 + $0x6c] ss:$16 sps:$4 sm:$0xff]  }
  0x2b   :  { %v3218_v14 = vld [vmem:[#allocation2 + $0x60] ss:$16 sps:$4 sm:$0xff]   ;;  %v3219_v15 = vld [vmem:[#allocation2 + $0x68] ss:$16 sps:$4 sm:$0xff]   ;;  %v3220_v16 = vld [vmem:[#allocation2 + $0x84] ss:$16 sps:$4 sm:$0xff]  }
  0x2c   :  { %1638 = vmatpush1.bf16.msra.mxu0 %v3206_v6  ;;  %1802 = vmatpush1.bf16.msra.mxu1 %v3207_v7  ;;  %v3222_v17 = vld [vmem:[#allocation2 + $0x8c] ss:$16 sps:$4 sm:$0xff]   ;;  %v3224_v18 = vld [vmem:[#allocation2 + $0x80] ss:$16 sps:$4 sm:$0xff]   ;;  %v3225_v19 = vld [vmem:[#allocation2 + $0x88] ss:$16 sps:$4 sm:$0xff]  }
  0x2d   :  { %1639 = vmatprep.subr.bf16.mxu0 %v3208_v8  ;;  %1803 = vmatprep.subr.bf16.mxu1 %v3210_v9  ;;  %v3226_v20 = vld [vmem:[#allocation2 + $0xa4] ss:$16 sps:$4 sm:$0xff]   ;;  %v3228_v21 = vld [vmem:[#allocation2 + $0xac] ss:$16 sps:$4 sm:$0xff]   ;;  %v3230_v22 = vld [vmem:[#allocation2 + $0xa0] ss:$16 sps:$4 sm:$0xff]  }
  0x2e   :  { %v3231_v23 = vld [vmem:[#allocation2 + $0xa8] ss:$16 sps:$4 sm:$0xff]   ;;  %v3232_v24 = vld [vmem:[#allocation2 + $0xc4] ss:$16 sps:$4 sm:$0xff]   ;;  %v3234_v25 = vld [vmem:[#allocation2 + $0xcc] ss:$16 sps:$4 sm:$0xff]  }
  0x2f   :  { %v3236_v26 = vld [vmem:[#allocation2 + $0xc0] ss:$16 sps:$4 sm:$0xff]   ;;  %v3237_v27 = vld [vmem:[#allocation2 + $0xc8] ss:$16 sps:$4 sm:$0xff]   ;;  %v3238_v28 = vld [vmem:[#allocation2 + $0xe4] ss:$16 sps:$4 sm:$0xff]  }
  0x30   :  { %1640 = vmatpush1.bf16.msra.mxu0 %v3212_v10  ;;  %1804 = vmatpush1.bf16.msra.mxu1 %v3213_v11  ;;  %v3240_v29 = vld [vmem:[#allocation2 + $0xec] ss:$16 sps:$4 sm:$0xff]   ;;  %v3242_v30 = vld [vmem:[#allocation2 + $0xe0] ss:$16 sps:$4 sm:$0xff]   ;;  %v3243_v31 = vld [vmem:[#allocation2 + $0xe8] ss:$16 sps:$4 sm:$0xff]  }
  0x31   :  { %1641 = vmatprep.subr.bf16.mxu0 %v3214_v12  ;;  %1805 = vmatprep.subr.bf16.mxu1 %v3216_v13  ;;  %v3244_v32 = vld [vmem:[#allocation2 + $0x104] ss:$16 sps:$4 sm:$0xff]   ;;  %v3246_v33 = vld [vmem:[#allocation2 + $0x10c] ss:$16 sps:$4 sm:$0xff]   ;;  %v3248_v34 = vld [vmem:[#allocation2 + $0x100] ss:$16 sps:$4 sm:$0xff]  }
  0x32   :  { %v3249_v35 = vld [vmem:[#allocation2 + $0x108] ss:$16 sps:$4 sm:$0xff]   ;;  %v3250_v36 = vld [vmem:[#allocation2 + $0x124] ss:$16 sps:$4 sm:$0xff]   ;;  %v3252_v37 = vld [vmem:[#allocation2 + $0x12c] ss:$16 sps:$4 sm:$0xff]  }
  0x33   :  { %v3254_v38 = vld [vmem:[#allocation2 + $0x120] ss:$16 sps:$4 sm:$0xff]   ;;  %v3255_v39 = vld [vmem:[#allocation2 + $0x128] ss:$16 sps:$4 sm:$0xff]   ;;  %v3256_v40 = vld [vmem:[#allocation2 + $0x144] ss:$16 sps:$4 sm:$0xff]  }
  0x34   :  { %1642 = vmatpush1.bf16.msra.mxu0 %v3218_v14  ;;  %1806 = vmatpush1.bf16.msra.mxu1 %v3219_v15  ;;  %v3258_v41 = vld [vmem:[#allocation2 + $0x14c] ss:$16 sps:$4 sm:$0xff]   ;;  %v3260_v42 = vld [vmem:[#allocation2 + $0x140] ss:$16 sps:$4 sm:$0xff]   ;;  %v3261_v43 = vld [vmem:[#allocation2 + $0x148] ss:$16 sps:$4 sm:$0xff]  }
  0x35   :  { %1643 = vmatprep.subr.bf16.mxu0 %v3220_v16  ;;  %1807 = vmatprep.subr.bf16.mxu1 %v3222_v17  ;;  %v3262_v44 = vld [vmem:[#allocation2 + $0x164] ss:$16 sps:$4 sm:$0xff]   ;;  %v3264_v45 = vld [vmem:[#allocation2 + $0x16c] ss:$16 sps:$4 sm:$0xff]   ;;  %v3266_v47 = vld [vmem:[#allocation2 + $0x160] ss:$16 sps:$4 sm:$0xff]  }
  0x36   :  { %v62_v46 = vld [vmem:[%s3968_s0 + $0x8] sm:$0xff]  ;;  %v3268_v50 = vld [vmem:[#allocation2 + $0x184] ss:$16 sps:$4 sm:$0xff]   ;;  %v3272_v52 = vld [vmem:[#allocation2 + $0x180] ss:$16 sps:$4 sm:$0xff]   ;;  %vm3759_vm0 = vmmov 0  }
  0x37   :  { %v70_v48 = vpack.c.bf16 %v62_v46, %v62_v46  ;;  %v3267_v49 = vld [vmem:[#allocation2 + $0x168] ss:$16 sps:$4 sm:$0xff]   ;;  %v3270_v51 = vld [vmem:[#allocation2 + $0x18c] ss:$16 sps:$4 sm:$0xff]   ;;  %v3274_v54 = vld [vmem:[#allocation2 + $0x1a4] ss:$16 sps:$4 sm:$0xff]  }
  0x38   :  { %1644 = vmatpush1.bf16.msra.mxu0 %v3224_v18  ;;  %1808 = vmatpush1.bf16.msra.mxu1 %v3225_v19  ;;  %v3273_v53 = vld [vmem:[#allocation2 + $0x188] ss:$16 sps:$4 sm:$0xff]   ;;  %v3276_v55 = vld [vmem:[#allocation2 + $0x1ac] ss:$16 sps:$4 sm:$0xff]   ;;  %v3278_v56 = vld [vmem:[#allocation2 + $0x1a0] ss:$16 sps:$4 sm:$0xff]  }
  0x39   :  { %1645 = vmatprep.subr.bf16.mxu0 %v3226_v20  ;;  %1809 = vmatprep.subr.bf16.mxu1 %v3228_v21  ;;  %v3279_v57 = vld [vmem:[#allocation2 + $0x1a8] ss:$16 sps:$4 sm:$0xff]   ;;  %v3280_v58 = vld [vmem:[#allocation2 + $0x1c4] ss:$16 sps:$4 sm:$0xff]   ;;  %v3282_v59 = vld [vmem:[#allocation2 + $0x1cc] ss:$16 sps:$4 sm:$0xff]  }
  0x3a   :  { %1667 = vmatprep.mubr.bf16.mxu0 %v70_v48  ;;  %1831 = vmatprep.mubr.bf16.mxu1 %v70_v48  ;;  %v3284_v60 = vld [vmem:[#allocation2 + $0x1c0] ss:$16 sps:$4 sm:$0xff]   ;;  %v3285_v61 = vld [vmem:[#allocation2 + $0x1c8] ss:$16 sps:$4 sm:$0xff]   ;;  %v3286_v62 = vld [vmem:[#allocation2 + $0x1e4] ss:$16 sps:$4 sm:$0xff]  }
  0x3b   :  { %v3288_v63 = vld [vmem:[#allocation2 + $0x1ec] ss:$16 sps:$4 sm:$0xff]   ;;  %v3290_v0 = vld [vmem:[#allocation2 + $0x1e0] ss:$16 sps:$4 sm:$0xff]   ;;  %v3291_v1 = vld [vmem:[#allocation2 + $0x1e8] ss:$16 sps:$4 sm:$0xff]  }
  0x3c   :  { %1646 = vmatpush1.bf16.msra.mxu0 %v3230_v22  ;;  %1810 = vmatpush1.bf16.msra.mxu1 %v3231_v23  ;;  %v61_v2 = vld [vmem:[%s3968_s0] sm:$0xff]  ;;  %v3297_v4 = vld [vmem:[#allocation2 + $0x20c] ss:$16 sps:$4 sm:$0xff]   ;;  %v3295_v7 = vld [vmem:[#allocation2 + $0x208] ss:$16 sps:$4 sm:$0xff]  }
  0x3d   :  { %1647 = vmatprep.subr.bf16.mxu0 %v3232_v24  ;;  %1811 = vmatprep.subr.bf16.mxu1 %v3234_v25  ;;  %v3294_v3 = vld [vmem:[#allocation2 + $0x204] ss:$16 sps:$4 sm:$0xff]   ;;  %v69_v5 = vpack.c.bf16 %v61_v2, %v61_v2  ;;  %v3292_v6 = vld [vmem:[#allocation2 + $0x200] ss:$16 sps:$4 sm:$0xff]   ;;  %v3303_v9 = vld [vmem:[#allocation2 + $0x22c] ss:$16 sps:$4 sm:$0xff]  }
  0x3e   :  { %v3300_v8 = vld [vmem:[#allocation2 + $0x224] ss:$16 sps:$4 sm:$0xff]   ;;  %v3298_v10 = vld [vmem:[#allocation2 + $0x220] ss:$16 sps:$4 sm:$0xff]   ;;  %v3301_v11 = vld [vmem:[#allocation2 + $0x228] ss:$16 sps:$4 sm:$0xff]  }
  0x3f   :  { %v3306_v12 = vld [vmem:[#allocation2 + $0x244] ss:$16 sps:$4 sm:$0xff]   ;;  %v3309_v13 = vld [vmem:[#allocation2 + $0x24c] ss:$16 sps:$4 sm:$0xff]   ;;  %v3304_v14 = vld [vmem:[#allocation2 + $0x240] ss:$16 sps:$4 sm:$0xff]  }
  0x40   :  { %1648 = vmatpush1.bf16.msra.mxu0 %v3236_v26  ;;  %1812 = vmatpush1.bf16.msra.mxu1 %v3237_v27  ;;  %v3307_v15 = vld [vmem:[#allocation2 + $0x248] ss:$16 sps:$4 sm:$0xff]   ;;  %v3312_v16 = vld [vmem:[#allocation2 + $0x264] ss:$16 sps:$4 sm:$0xff]   ;;  %v3315_v17 = vld [vmem:[#allocation2 + $0x26c] ss:$16 sps:$4 sm:$0xff]  }
  0x41   :  { %1649 = vmatprep.subr.bf16.mxu0 %v3238_v28  ;;  %1813 = vmatprep.subr.bf16.mxu1 %v3240_v29  ;;  %v3310_v18 = vld [vmem:[#allocation2 + $0x260] ss:$16 sps:$4 sm:$0xff]   ;;  %v3313_v19 = vld [vmem:[#allocation2 + $0x268] ss:$16 sps:$4 sm:$0xff]   ;;  %v3318_v20 = vld [vmem:[#allocation2 + $0x284] ss:$16 sps:$4 sm:$0xff]  }
  0x42   :  { %v3321_v21 = vld [vmem:[#allocation2 + $0x28c] ss:$16 sps:$4 sm:$0xff]   ;;  %v3316_v22 = vld [vmem:[#allocation2 + $0x280] ss:$16 sps:$4 sm:$0xff]   ;;  %v3319_v23 = vld [vmem:[#allocation2 + $0x288] ss:$16 sps:$4 sm:$0xff]  }
  0x43   :  { %v3324_v24 = vld [vmem:[#allocation2 + $0x2a4] ss:$16 sps:$4 sm:$0xff]   ;;  %v3327_v25 = vld [vmem:[#allocation2 + $0x2ac] ss:$16 sps:$4 sm:$0xff]   ;;  %v3322_v26 = vld [vmem:[#allocation2 + $0x2a0] ss:$16 sps:$4 sm:$0xff]  }
  0x44   :  { %1650 = vmatpush1.bf16.msra.mxu0 %v3242_v30  ;;  %1814 = vmatpush1.bf16.msra.mxu1 %v3243_v31  ;;  %v3325_v27 = vld [vmem:[#allocation2 + $0x2a8] ss:$16 sps:$4 sm:$0xff]   ;;  %v3330_v28 = vld [vmem:[#allocation2 + $0x2c4] ss:$16 sps:$4 sm:$0xff]   ;;  %v3333_v29 = vld [vmem:[#allocation2 + $0x2cc] ss:$16 sps:$4 sm:$0xff]  }
  0x45   :  { %1651 = vmatprep.subr.bf16.mxu0 %v3244_v32  ;;  %1815 = vmatprep.subr.bf16.mxu1 %v3246_v33  ;;  %v64_v30 = vld [vmem:[%s3968_s0 + $0x18] sm:$0xff]  ;;  %v3328_v31 = vld [vmem:[#allocation2 + $0x2c0] ss:$16 sps:$4 sm:$0xff]   ;;  %v3354_v46 = vld [vmem:[#allocation2 + $0x344] ss:$16 sps:$4 sm:$0xff]  }
  0x46   :  { %v72_v32 = vpack.c.bf16 %v64_v30, %v64_v30  ;;  %v3331_v33 = vld [vmem:[#allocation2 + $0x2c8] ss:$16 sps:$4 sm:$0xff]   ;;  %v3352_v48 = vld [vmem:[#allocation2 + $0x340] ss:$16 sps:$4 sm:$0xff]   ;;  %v3384_v2 = vld [vmem:[#allocation2 + $0x3e4] ss:$16 sps:$4 sm:$0xff]  }
  0x47   :  { %v3420_v30 = vld [vmem:[#allocation2 + $0x4a4] ss:$16 sps:$4 sm:$0xff]  }
  0x48   :  { %1652 = vmatpush1.bf16.msra.mxu0 %v3248_v34  ;;  %1816 = vmatpush1.bf16.msra.mxu1 %v3249_v35  ;;  %v3336_v34 = vld [vmem:[#allocation2 + $0x2e4] ss:$16 sps:$4 sm:$0xff]   ;;  %v3339_v35 = vld [vmem:[#allocation2 + $0x2ec] ss:$16 sps:$4 sm:$0xff]  }
  0x49   :  { %1653 = vmatprep.subr.bf16.mxu0 %v3250_v36  ;;  %1817 = vmatprep.subr.bf16.mxu1 %v3252_v37  ;;  %v3334_v36 = vld [vmem:[#allocation2 + $0x2e0] ss:$16 sps:$4 sm:$0xff]   ;;  %v3337_v37 = vld [vmem:[#allocation2 + $0x2e8] ss:$16 sps:$4 sm:$0xff]  }
  0x4c   :  { %1654 = vmatpush1.bf16.msra.mxu0 %v3254_v38  ;;  %1818 = vmatpush1.bf16.msra.mxu1 %v3255_v39  ;;  %v3342_v38 = vld [vmem:[#allocation2 + $0x304] ss:$16 sps:$4 sm:$0xff]   ;;  %v3345_v39 = vld [vmem:[#allocation2 + $0x30c] ss:$16 sps:$4 sm:$0xff]  }
  0x4d   :  { %1655 = vmatprep.subr.bf16.mxu0 %v3256_v40  ;;  %1819 = vmatprep.subr.bf16.mxu1 %v3258_v41  ;;  %v3340_v40 = vld [vmem:[#allocation2 + $0x300] ss:$16 sps:$4 sm:$0xff]   ;;  %v3343_v41 = vld [vmem:[#allocation2 + $0x308] ss:$16 sps:$4 sm:$0xff]  }
  0x50   :  { %1656 = vmatpush1.bf16.msra.mxu0 %v3260_v42  ;;  %1820 = vmatpush1.bf16.msra.mxu1 %v3261_v43  ;;  %v3348_v42 = vld [vmem:[#allocation2 + $0x324] ss:$16 sps:$4 sm:$0xff]   ;;  %v3351_v43 = vld [vmem:[#allocation2 + $0x32c] ss:$16 sps:$4 sm:$0xff]  }
  0x51   :  { %1657 = vmatprep.subr.bf16.mxu0 %v3262_v44  ;;  %1821 = vmatprep.subr.bf16.mxu1 %v3264_v45  ;;  %v3346_v44 = vld [vmem:[#allocation2 + $0x320] ss:$16 sps:$4 sm:$0xff]   ;;  %v3349_v45 = vld [vmem:[#allocation2 + $0x328] ss:$16 sps:$4 sm:$0xff]  }
  0x54   :  { %1658 = vmatpush1.bf16.msra.mxu0 %v3266_v47  ;;  %1822 = vmatpush1.bf16.msra.mxu1 %v3267_v49  ;;  %v3357_v47 = vld [vmem:[#allocation2 + $0x34c] ss:$16 sps:$4 sm:$0xff]   ;;  %v3355_v49 = vld [vmem:[#allocation2 + $0x348] ss:$16 sps:$4 sm:$0xff]  }
  0x55   :  { %1659 = vmatprep.subr.bf16.mxu0 %v3268_v50  ;;  %1823 = vmatprep.subr.bf16.mxu1 %v3270_v51  ;;  %v3360_v50 = vld [vmem:[#allocation2 + $0x364] ss:$16 sps:$4 sm:$0xff]   ;;  %v3363_v51 = vld [vmem:[#allocation2 + $0x36c] ss:$16 sps:$4 sm:$0xff]  }
  0x58   :  { %1660 = vmatpush1.bf16.msra.mxu0 %v3272_v52  ;;  %1824 = vmatpush1.bf16.msra.mxu1 %v3273_v53  ;;  %v3358_v52 = vld [vmem:[#allocation2 + $0x360] ss:$16 sps:$4 sm:$0xff]   ;;  %v3361_v53 = vld [vmem:[#allocation2 + $0x368] ss:$16 sps:$4 sm:$0xff]  }
  0x59   :  { %1661 = vmatprep.subr.bf16.mxu0 %v3274_v54  ;;  %1825 = vmatprep.subr.bf16.mxu1 %v3276_v55  ;;  %v3366_v54 = vld [vmem:[#allocation2 + $0x384] ss:$16 sps:$4 sm:$0xff]   ;;  %v3369_v55 = vld [vmem:[#allocation2 + $0x38c] ss:$16 sps:$4 sm:$0xff]  }
  0x5c   :  { %1662 = vmatpush1.bf16.msra.mxu0 %v3278_v56  ;;  %1826 = vmatpush1.bf16.msra.mxu1 %v3279_v57  ;;  %v3364_v56 = vld [vmem:[#allocation2 + $0x380] ss:$16 sps:$4 sm:$0xff]   ;;  %v3367_v57 = vld [vmem:[#allocation2 + $0x388] ss:$16 sps:$4 sm:$0xff]  }
  0x5d   :  { %1663 = vmatprep.subr.bf16.mxu0 %v3280_v58  ;;  %1827 = vmatprep.subr.bf16.mxu1 %v3282_v59  ;;  %v3372_v58 = vld [vmem:[#allocation2 + $0x3a4] ss:$16 sps:$4 sm:$0xff]   ;;  %v3375_v59 = vld [vmem:[#allocation2 + $0x3ac] ss:$16 sps:$4 sm:$0xff]  }
  0x60   :  { %1664 = vmatpush1.bf16.msra.mxu0 %v3284_v60  ;;  %1828 = vmatpush1.bf16.msra.mxu1 %v3285_v61  ;;  %v3370_v60 = vld [vmem:[#allocation2 + $0x3a0] ss:$16 sps:$4 sm:$0xff]   ;;  %v3373_v61 = vld [vmem:[#allocation2 + $0x3a8] ss:$16 sps:$4 sm:$0xff]  }
  0x61   :  { %1665 = vmatprep.subr.bf16.mxu0 %v3286_v62  ;;  %1829 = vmatprep.subr.bf16.mxu1 %v3288_v63  ;;  %v3378_v62 = vld [vmem:[#allocation2 + $0x3c4] ss:$16 sps:$4 sm:$0xff]   ;;  %v3381_v63 = vld [vmem:[#allocation2 + $0x3cc] ss:$16 sps:$4 sm:$0xff]  }
  0x64   :  { %1666 = vmatpush1.bf16.msra.mxu0 %v3290_v0  ;;  %1830 = vmatpush1.bf16.msra.mxu1 %v3291_v1  ;;  %v3376_v0 = vld [vmem:[#allocation2 + $0x3c0] ss:$16 sps:$4 sm:$0xff]   ;;  %v3379_v1 = vld [vmem:[#allocation2 + $0x3c8] ss:$16 sps:$4 sm:$0xff]  }
  0x65   :  { %1676 = vmatprep.subr.bf16.mxu0 %v3294_v3  ;;  %1840 = vmatprep.subr.bf16.mxu1 %v3297_v4  ;;  %v3387_v3 = vld [vmem:[#allocation2 + $0x3ec] ss:$16 sps:$4 sm:$0xff]   ;;  %v3382_v4 = vld [vmem:[#allocation2 + $0x3e0] ss:$16 sps:$4 sm:$0xff]  }
  0x67   :  { %1668 = vmatmul.mubr.bf16.vlgmr.msra.gmra.mrb[0].mxu0 %v69_v5  ;;  %1832 = vmatmul.mubr.bf16.vlgmr.msra.gmra.mrb[0].mxu1 %v69_v5  ;;  %v3385_v5 = vld [vmem:[#allocation2 + $0x3e8] ss:$16 sps:$4 sm:$0xff]  }
  0x68   :  { %1677 = vmatpush1.bf16.msra.mxu0 %v3292_v6  ;;  %1841 = vmatpush1.bf16.msra.mxu1 %v3295_v7  ;;  %v3390_v6 = vld [vmem:[#allocation2 + $0x404] ss:$16 sps:$4 sm:$0xff]  }
  0x69   :  { %1678 = vmatprep.subr.bf16.mxu0 %v3300_v8  ;;  %1842 = vmatprep.subr.bf16.mxu1 %v3303_v9  ;;  %v63_v7 = vld [vmem:[%s3968_s0 + $0x10] sm:$0xff]  ;;  %v3393_v8 = vld [vmem:[#allocation2 + $0x40c] ss:$16 sps:$4 sm:$0xff]  }
  0x6a   :  { %1708 = vmatprep.mubr.bf16.mxu0 %v72_v32  ;;  %1872 = vmatprep.mubr.bf16.mxu1 %v72_v32  ;;  %v3388_v9 = vld [vmem:[#allocation2 + $0x400] ss:$16 sps:$4 sm:$0xff]  }
  0x6b   :  { %v3418_v32 = vld [vmem:[#allocation2 + $0x4a0] ss:$16 sps:$4 sm:$0xff]  }
  0x6c   :  { %1679 = vmatpush1.bf16.msra.mxu0 %v3298_v10  ;;  %1843 = vmatpush1.bf16.msra.mxu1 %v3301_v11  ;;  %v3391_v10 = vld [vmem:[#allocation2 + $0x408] ss:$16 sps:$4 sm:$0xff]   ;;  %v71_v11 = vpack.c.bf16 %v63_v7, %v63_v7  ;;  %v3483_v7 = vld [vmem:[#allocation2 + $0x5ec] ss:$16 sps:$4 sm:$0xff]  }
  0x6d   :  { %1680 = vmatprep.subr.bf16.mxu0 %v3306_v12  ;;  %1844 = vmatprep.subr.bf16.mxu1 %v3309_v13  ;;  %v3396_v12 = vld [vmem:[#allocation2 + $0x424] ss:$16 sps:$4 sm:$0xff]   ;;  %v3399_v13 = vld [vmem:[#allocation2 + $0x42c] ss:$16 sps:$4 sm:$0xff]  }
  0x70   :  { %1681 = vmatpush1.bf16.msra.mxu0 %v3304_v14  ;;  %1845 = vmatpush1.bf16.msra.mxu1 %v3307_v15  ;;  %v66_v14 = vld [vmem:[%s3968_s0 + $0x28] sm:$0xff] }
  0x71   :  { %1682 = vmatprep.subr.bf16.mxu0 %v3312_v16  ;;  %1846 = vmatprep.subr.bf16.mxu1 %v3315_v17  ;;  %v74_v15 = vpack.c.bf16 %v66_v14, %v66_v14  ;;  %v3394_v16 = vld [vmem:[#allocation2 + $0x420] ss:$16 sps:$4 sm:$0xff]   ;;  %v3397_v17 = vld [vmem:[#allocation2 + $0x428] ss:$16 sps:$4 sm:$0xff]  }
  0x72   :  { %v3487_v14 = vld [vmem:[#allocation2 + $0x608] ss:$16 sps:$4 sm:$0xff]  }
  0x74   :  { %1683 = vmatpush1.bf16.msra.mxu0 %v3310_v18  ;;  %1847 = vmatpush1.bf16.msra.mxu1 %v3313_v19  ;;  %v3402_v18 = vld [vmem:[#allocation2 + $0x444] ss:$16 sps:$4 sm:$0xff]   ;;  %v3405_v19 = vld [vmem:[#allocation2 + $0x44c] ss:$16 sps:$4 sm:$0xff]  }
  0x75   :  { %1684 = vmatprep.subr.bf16.mxu0 %v3318_v20  ;;  %1848 = vmatprep.subr.bf16.mxu1 %v3321_v21  ;;  %v3400_v20 = vld [vmem:[#allocation2 + $0x440] ss:$16 sps:$4 sm:$0xff]   ;;  %v3403_v21 = vld [vmem:[#allocation2 + $0x448] ss:$16 sps:$4 sm:$0xff]  }
  0x78   :  { %1685 = vmatpush1.bf16.msra.mxu0 %v3316_v22  ;;  %1849 = vmatpush1.bf16.msra.mxu1 %v3319_v23  ;;  %v3408_v22 = vld [vmem:[#allocation2 + $0x464] ss:$16 sps:$4 sm:$0xff]   ;;  %v3411_v23 = vld [vmem:[#allocation2 + $0x46c] ss:$16 sps:$4 sm:$0xff]  }
  0x79   :  { %1686 = vmatprep.subr.bf16.mxu0 %v3324_v24  ;;  %1850 = vmatprep.subr.bf16.mxu1 %v3327_v25  ;;  %v3406_v24 = vld [vmem:[#allocation2 + $0x460] ss:$16 sps:$4 sm:$0xff]   ;;  %v3409_v25 = vld [vmem:[#allocation2 + $0x468] ss:$16 sps:$4 sm:$0xff]  }
  0x7c   :  { %1687 = vmatpush1.bf16.msra.mxu0 %v3322_v26  ;;  %1851 = vmatpush1.bf16.msra.mxu1 %v3325_v27  ;;  %v3414_v26 = vld [vmem:[#allocation2 + $0x484] ss:$16 sps:$4 sm:$0xff]   ;;  %v3417_v27 = vld [vmem:[#allocation2 + $0x48c] ss:$16 sps:$4 sm:$0xff]  }
  0x7d   :  { %1688 = vmatprep.subr.bf16.mxu0 %v3330_v28  ;;  %1852 = vmatprep.subr.bf16.mxu1 %v3333_v29  ;;  %v3412_v28 = vld [vmem:[#allocation2 + $0x480] ss:$16 sps:$4 sm:$0xff]   ;;  %v3415_v29 = vld [vmem:[#allocation2 + $0x488] ss:$16 sps:$4 sm:$0xff]  }
  0x80   :  { %1689 = vmatpush1.bf16.msra.mxu0 %v3328_v31  ;;  %1853 = vmatpush1.bf16.msra.mxu1 %v3331_v33  ;;  %v3423_v31 = vld [vmem:[#allocation2 + $0x4ac] ss:$16 sps:$4 sm:$0xff]   ;;  %v3421_v33 = vld [vmem:[#allocation2 + $0x4a8] ss:$16 sps:$4 sm:$0xff]  }
  0x81   :  { %1690 = vmatprep.subr.bf16.mxu0 %v3336_v34  ;;  %1854 = vmatprep.subr.bf16.mxu1 %v3339_v35  ;;  %v3426_v34 = vld [vmem:[#allocation2 + $0x4c4] ss:$16 sps:$4 sm:$0xff]   ;;  %v3429_v35 = vld [vmem:[#allocation2 + $0x4cc] ss:$16 sps:$4 sm:$0xff]  }
  0x84   :  { %1691 = vmatpush1.bf16.msra.mxu0 %v3334_v36  ;;  %1855 = vmatpush1.bf16.msra.mxu1 %v3337_v37  ;;  %v3424_v36 = vld [vmem:[#allocation2 + $0x4c0] ss:$16 sps:$4 sm:$0xff]   ;;  %v3427_v37 = vld [vmem:[#allocation2 + $0x4c8] ss:$16 sps:$4 sm:$0xff]  }
  0x85   :  { %1692 = vmatprep.subr.bf16.mxu0 %v3342_v38  ;;  %1856 = vmatprep.subr.bf16.mxu1 %v3345_v39  ;;  %v3432_v38 = vld [vmem:[#allocation2 + $0x4e4] ss:$16 sps:$4 sm:$0xff]   ;;  %v3435_v39 = vld [vmem:[#allocation2 + $0x4ec] ss:$16 sps:$4 sm:$0xff]  }
  0x88   :  { %1693 = vmatpush1.bf16.msra.mxu0 %v3340_v40  ;;  %1857 = vmatpush1.bf16.msra.mxu1 %v3343_v41  ;;  %v3430_v40 = vld [vmem:[#allocation2 + $0x4e0] ss:$16 sps:$4 sm:$0xff]   ;;  %v3433_v41 = vld [vmem:[#allocation2 + $0x4e8] ss:$16 sps:$4 sm:$0xff]  }
  0x89   :  { %1694 = vmatprep.subr.bf16.mxu0 %v3348_v42  ;;  %1858 = vmatprep.subr.bf16.mxu1 %v3351_v43  ;;  %v3438_v42 = vld [vmem:[#allocation2 + $0x504] ss:$16 sps:$4 sm:$0xff]   ;;  %v3441_v43 = vld [vmem:[#allocation2 + $0x50c] ss:$16 sps:$4 sm:$0xff]  }
  0x8c   :  { %1695 = vmatpush1.bf16.msra.mxu0 %v3346_v44  ;;  %1859 = vmatpush1.bf16.msra.mxu1 %v3349_v45  ;;  %v3436_v44 = vld [vmem:[#allocation2 + $0x500] ss:$16 sps:$4 sm:$0xff]   ;;  %v3439_v45 = vld [vmem:[#allocation2 + $0x508] ss:$16 sps:$4 sm:$0xff]  }
  0x8d   :  { %1696 = vmatprep.subr.bf16.mxu0 %v3354_v46  ;;  %1860 = vmatprep.subr.bf16.mxu1 %v3357_v47  ;;  %v3444_v46 = vld [vmem:[#allocation2 + $0x524] ss:$16 sps:$4 sm:$0xff]   ;;  %v3447_v47 = vld [vmem:[#allocation2 + $0x52c] ss:$16 sps:$4 sm:$0xff]  }
  0x90   :  { %1697 = vmatpush1.bf16.msra.mxu0 %v3352_v48  ;;  %1861 = vmatpush1.bf16.msra.mxu1 %v3355_v49  ;;  %v3442_v48 = vld [vmem:[#allocation2 + $0x520] ss:$16 sps:$4 sm:$0xff]   ;;  %v3445_v49 = vld [vmem:[#allocation2 + $0x528] ss:$16 sps:$4 sm:$0xff]  }
  0x91   :  { %1698 = vmatprep.subr.bf16.mxu0 %v3360_v50  ;;  %1862 = vmatprep.subr.bf16.mxu1 %v3363_v51  ;;  %v3450_v50 = vld [vmem:[#allocation2 + $0x544] ss:$16 sps:$4 sm:$0xff]   ;;  %v3453_v51 = vld [vmem:[#allocation2 + $0x54c] ss:$16 sps:$4 sm:$0xff]  }
  0x94   :  { %1699 = vmatpush1.bf16.msra.mxu0 %v3358_v52  ;;  %1863 = vmatpush1.bf16.msra.mxu1 %v3361_v53  ;;  %v3448_v52 = vld [vmem:[#allocation2 + $0x540] ss:$16 sps:$4 sm:$0xff]   ;;  %v3451_v53 = vld [vmem:[#allocation2 + $0x548] ss:$16 sps:$4 sm:$0xff]  }
  0x95   :  { %1700 = vmatprep.subr.bf16.mxu0 %v3366_v54  ;;  %1864 = vmatprep.subr.bf16.mxu1 %v3369_v55  ;;  %v3456_v54 = vld [vmem:[#allocation2 + $0x564] ss:$16 sps:$4 sm:$0xff]   ;;  %v3459_v55 = vld [vmem:[#allocation2 + $0x56c] ss:$16 sps:$4 sm:$0xff]  }
  0x98   :  { %1701 = vmatpush1.bf16.msra.mxu0 %v3364_v56  ;;  %1865 = vmatpush1.bf16.msra.mxu1 %v3367_v57  ;;  %v3454_v56 = vld [vmem:[#allocation2 + $0x560] ss:$16 sps:$4 sm:$0xff]   ;;  %v3457_v57 = vld [vmem:[#allocation2 + $0x568] ss:$16 sps:$4 sm:$0xff]  }
  0x99   :  { %1702 = vmatprep.subr.bf16.mxu0 %v3372_v58  ;;  %1866 = vmatprep.subr.bf16.mxu1 %v3375_v59  ;;  %v3462_v58 = vld [vmem:[#allocation2 + $0x584] ss:$16 sps:$4 sm:$0xff]   ;;  %v3465_v59 = vld [vmem:[#allocation2 + $0x58c] ss:$16 sps:$4 sm:$0xff]  }
  0x9c   :  { %1703 = vmatpush1.bf16.msra.mxu0 %v3370_v60  ;;  %1867 = vmatpush1.bf16.msra.mxu1 %v3373_v61  ;;  %v3460_v60 = vld [vmem:[#allocation2 + $0x580] ss:$16 sps:$4 sm:$0xff]   ;;  %v3463_v61 = vld [vmem:[#allocation2 + $0x588] ss:$16 sps:$4 sm:$0xff]  }
  0x9d   :  { %1704 = vmatprep.subr.bf16.mxu0 %v3378_v62  ;;  %1868 = vmatprep.subr.bf16.mxu1 %v3381_v63  ;;  %v3468_v62 = vld [vmem:[#allocation2 + $0x5a4] ss:$16 sps:$4 sm:$0xff]   ;;  %v3471_v63 = vld [vmem:[#allocation2 + $0x5ac] ss:$16 sps:$4 sm:$0xff]  }
  0xa0   :  { %1705 = vmatpush1.bf16.msra.mxu0 %v3376_v0  ;;  %1869 = vmatpush1.bf16.msra.mxu1 %v3379_v1  ;;  %v3466_v0 = vld [vmem:[#allocation2 + $0x5a0] ss:$16 sps:$4 sm:$0xff]   ;;  %v3469_v1 = vld [vmem:[#allocation2 + $0x5a8] ss:$16 sps:$4 sm:$0xff]  }
  0xa1   :  { %1706 = vmatprep.subr.bf16.mxu0 %v3384_v2  ;;  %1870 = vmatprep.subr.bf16.mxu1 %v3387_v3  ;;  %v3474_v2 = vld [vmem:[#allocation2 + $0x5c4] ss:$16 sps:$4 sm:$0xff]   ;;  %v3477_v3 = vld [vmem:[#allocation2 + $0x5cc] ss:$16 sps:$4 sm:$0xff]  }
  0xa4   :  { %1707 = vmatpush1.bf16.msra.mxu0 %v3382_v4  ;;  %1871 = vmatpush1.bf16.msra.mxu1 %v3385_v5  ;;  %v3472_v4 = vld [vmem:[#allocation2 + $0x5c0] ss:$16 sps:$4 sm:$0xff]   ;;  %v3475_v5 = vld [vmem:[#allocation2 + $0x5c8] ss:$16 sps:$4 sm:$0xff]  }
  0xa5   :  { %1717 = vmatprep.subr.bf16.mxu0 %v3390_v6  ;;  %1881 = vmatprep.subr.bf16.mxu1 %v3393_v8  ;;  %v3480_v6 = vld [vmem:[#allocation2 + $0x5e4] ss:$16 sps:$4 sm:$0xff]   ;;  %v3478_v8 = vld [vmem:[#allocation2 + $0x5e0] ss:$16 sps:$4 sm:$0xff]  }
  0xa7   :  { %1709 = vmatmul.mubr.bf16.vlgmr.msra.gmra.mrb[0].mxu0 %v71_v11  ;;  %1873 = vmatmul.mubr.bf16.vlgmr.msra.gmra.mrb[0].mxu1 %v71_v11  ;;  %v65_v11 = vld [vmem:[%s3968_s0 + $0x20] sm:$0xff] }
  0xa8   :  { %1718 = vmatpush1.bf16.msra.mxu0 %v3388_v9  ;;  %1882 = vmatpush1.bf16.msra.mxu1 %v3391_v10  ;;  %v3481_v9 = vld [vmem:[#allocation2 + $0x5e8] ss:$16 sps:$4 sm:$0xff]   ;;  %v3486_v10 = vld [vmem:[#allocation2 + $0x604] ss:$16 sps:$4 sm:$0xff]  }
  0xa9   :  { %1719 = vmatprep.subr.bf16.mxu0 %v3396_v12  ;;  %1883 = vmatprep.subr.bf16.mxu1 %v3399_v13  ;;  %v3489_v12 = vld [vmem:[#allocation2 + $0x60c] ss:$16 sps:$4 sm:$0xff]   ;;  %v3484_v13 = vld [vmem:[#allocation2 + $0x600] ss:$16 sps:$4 sm:$0xff]  }
  0xaa   :  { %1749 = vmatprep.mubr.bf16.mxu0 %v74_v15  ;;  %1913 = vmatprep.mubr.bf16.mxu1 %v74_v15  ;;  %v73_v15 = vpack.c.bf16 %v65_v11, %v65_v11  ;;  %v3579_v11 = vld [vmem:[#allocation2 + $0x7ec] ss:$16 sps:$4 sm:$0xff]  }
  0xac   :  { %1720 = vmatpush1.bf16.msra.mxu0 %v3394_v16  ;;  %1884 = vmatpush1.bf16.msra.mxu1 %v3397_v17  ;;  %v3492_v16 = vld [vmem:[#allocation2 + $0x624] ss:$16 sps:$4 sm:$0xff]   ;;  %v68_v17 = vld [vmem:[%s3968_s0 + $0x38] sm:$0xff] }
  0xad   :  { %1721 = vmatprep.subr.bf16.mxu0 %v3402_v18  ;;  %1885 = vmatprep.subr.bf16.mxu1 %v3405_v19  ;;  %v3495_v18 = vld [vmem:[#allocation2 + $0x62c] ss:$16 sps:$4 sm:$0xff]   ;;  %v3490_v19 = vld [vmem:[#allocation2 + $0x620] ss:$16 sps:$4 sm:$0xff]  }
  0xb0   :  { %1722 = vmatpush1.bf16.msra.mxu0 %v3400_v20  ;;  %1886 = vmatpush1.bf16.msra.mxu1 %v3403_v21  ;;  %v3493_v20 = vld [vmem:[#allocation2 + $0x628] ss:$16 sps:$4 sm:$0xff]   ;;  %v76_v21 = vpack.c.bf16 %v68_v17, %v68_v17 }
  0xb1   :  { %1723 = vmatprep.subr.bf16.mxu0 %v3408_v22  ;;  %1887 = vmatprep.subr.bf16.mxu1 %v3411_v23  ;;  %v3498_v22 = vld [vmem:[#allocation2 + $0x644] ss:$16 sps:$4 sm:$0xff]   ;;  %v3501_v23 = vld [vmem:[#allocation2 + $0x64c] ss:$16 sps:$4 sm:$0xff]   ;;  %v3580_v17 = vld [vmem:[#allocation4] ss:$8 sps:$4 sm:$0xff]  }
  0xb4   :  { %1724 = vmatpush1.bf16.msra.mxu0 %v3406_v24  ;;  %1888 = vmatpush1.bf16.msra.mxu1 %v3409_v25  ;;  %v3496_v24 = vld [vmem:[#allocation2 + $0x640] ss:$16 sps:$4 sm:$0xff]   ;;  %v3499_v25 = vld [vmem:[#allocation2 + $0x648] ss:$16 sps:$4 sm:$0xff]  }
  0xb5   :  { %1725 = vmatprep.subr.bf16.mxu0 %v3414_v26  ;;  %1889 = vmatprep.subr.bf16.mxu1 %v3417_v27  ;;  %v3504_v26 = vld [vmem:[#allocation2 + $0x664] ss:$16 sps:$4 sm:$0xff]   ;;  %v3507_v27 = vld [vmem:[#allocation2 + $0x66c] ss:$16 sps:$4 sm:$0xff]  }
  0xb8   :  { %1726 = vmatpush1.bf16.msra.mxu0 %v3412_v28  ;;  %1890 = vmatpush1.bf16.msra.mxu1 %v3415_v29  ;;  %v3502_v28 = vld [vmem:[#allocation2 + $0x660] ss:$16 sps:$4 sm:$0xff]   ;;  %v3505_v29 = vld [vmem:[#allocation2 + $0x668] ss:$16 sps:$4 sm:$0xff]  }
  0xb9   :  { %1727 = vmatprep.subr.bf16.mxu0 %v3420_v30  ;;  %1891 = vmatprep.subr.bf16.mxu1 %v3423_v31  ;;  %v3510_v30 = vld [vmem:[#allocation2 + $0x684] ss:$16 sps:$4 sm:$0xff]   ;;  %v3513_v31 = vld [vmem:[#allocation2 + $0x68c] ss:$16 sps:$4 sm:$0xff]  }
  0xbc   :  { %1728 = vmatpush1.bf16.msra.mxu0 %v3418_v32  ;;  %1892 = vmatpush1.bf16.msra.mxu1 %v3421_v33  ;;  %v3508_v32 = vld [vmem:[#allocation2 + $0x680] ss:$16 sps:$4 sm:$0xff]   ;;  %v3511_v33 = vld [vmem:[#allocation2 + $0x688] ss:$16 sps:$4 sm:$0xff]  }
  0xbd   :  { %1729 = vmatprep.subr.bf16.mxu0 %v3426_v34  ;;  %1893 = vmatprep.subr.bf16.mxu1 %v3429_v35  ;;  %v3516_v34 = vld [vmem:[#allocation2 + $0x6a4] ss:$16 sps:$4 sm:$0xff]   ;;  %v3519_v35 = vld [vmem:[#allocation2 + $0x6ac] ss:$16 sps:$4 sm:$0xff]  }
  0xc0   :  { %1730 = vmatpush1.bf16.msra.mxu0 %v3424_v36  ;;  %1894 = vmatpush1.bf16.msra.mxu1 %v3427_v37  ;;  %v3514_v36 = vld [vmem:[#allocation2 + $0x6a0] ss:$16 sps:$4 sm:$0xff]   ;;  %v3517_v37 = vld [vmem:[#allocation2 + $0x6a8] ss:$16 sps:$4 sm:$0xff]  }
  0xc1   :  { %1731 = vmatprep.subr.bf16.mxu0 %v3432_v38  ;;  %1895 = vmatprep.subr.bf16.mxu1 %v3435_v39  ;;  %v3522_v38 = vld [vmem:[#allocation2 + $0x6c4] ss:$16 sps:$4 sm:$0xff]   ;;  %v3525_v39 = vld [vmem:[#allocation2 + $0x6cc] ss:$16 sps:$4 sm:$0xff]  }
  0xc4   :  { %1732 = vmatpush1.bf16.msra.mxu0 %v3430_v40  ;;  %1896 = vmatpush1.bf16.msra.mxu1 %v3433_v41  ;;  %v3520_v40 = vld [vmem:[#allocation2 + $0x6c0] ss:$16 sps:$4 sm:$0xff]   ;;  %v3523_v41 = vld [vmem:[#allocation2 + $0x6c8] ss:$16 sps:$4 sm:$0xff]  }
  0xc5   :  { %1733 = vmatprep.subr.bf16.mxu0 %v3438_v42  ;;  %1897 = vmatprep.subr.bf16.mxu1 %v3441_v43  ;;  %v3528_v42 = vld [vmem:[#allocation2 + $0x6e4] ss:$16 sps:$4 sm:$0xff]   ;;  %v3531_v43 = vld [vmem:[#allocation2 + $0x6ec] ss:$16 sps:$4 sm:$0xff]  }
  0xc8   :  { %1734 = vmatpush1.bf16.msra.mxu0 %v3436_v44  ;;  %1898 = vmatpush1.bf16.msra.mxu1 %v3439_v45  ;;  %v3526_v44 = vld [vmem:[#allocation2 + $0x6e0] ss:$16 sps:$4 sm:$0xff]   ;;  %v3529_v45 = vld [vmem:[#allocation2 + $0x6e8] ss:$16 sps:$4 sm:$0xff]  }
  0xc9   :  { %1735 = vmatprep.subr.bf16.mxu0 %v3444_v46  ;;  %1899 = vmatprep.subr.bf16.mxu1 %v3447_v47  ;;  %v3534_v46 = vld [vmem:[#allocation2 + $0x704] ss:$16 sps:$4 sm:$0xff]   ;;  %v3537_v47 = vld [vmem:[#allocation2 + $0x70c] ss:$16 sps:$4 sm:$0xff]  }
  0xcc   :  { %1736 = vmatpush1.bf16.msra.mxu0 %v3442_v48  ;;  %1900 = vmatpush1.bf16.msra.mxu1 %v3445_v49  ;;  %v3532_v48 = vld [vmem:[#allocation2 + $0x700] ss:$16 sps:$4 sm:$0xff]   ;;  %v3535_v49 = vld [vmem:[#allocation2 + $0x708] ss:$16 sps:$4 sm:$0xff]  }
  0xcd   :  { %1737 = vmatprep.subr.bf16.mxu0 %v3450_v50  ;;  %1901 = vmatprep.subr.bf16.mxu1 %v3453_v51  ;;  %v3540_v50 = vld [vmem:[#allocation2 + $0x724] ss:$16 sps:$4 sm:$0xff]   ;;  %v3543_v51 = vld [vmem:[#allocation2 + $0x72c] ss:$16 sps:$4 sm:$0xff]  }
  0xd0   :  { %1738 = vmatpush1.bf16.msra.mxu0 %v3448_v52  ;;  %1902 = vmatpush1.bf16.msra.mxu1 %v3451_v53  ;;  %v3538_v52 = vld [vmem:[#allocation2 + $0x720] ss:$16 sps:$4 sm:$0xff]   ;;  %v3541_v53 = vld [vmem:[#allocation2 + $0x728] ss:$16 sps:$4 sm:$0xff]  }
  0xd1   :  { %1739 = vmatprep.subr.bf16.mxu0 %v3456_v54  ;;  %1903 = vmatprep.subr.bf16.mxu1 %v3459_v55  ;;  %v3546_v54 = vld [vmem:[#allocation2 + $0x744] ss:$16 sps:$4 sm:$0xff]   ;;  %v3549_v55 = vld [vmem:[#allocation2 + $0x74c] ss:$16 sps:$4 sm:$0xff]  }
  0xd4   :  { %1740 = vmatpush1.bf16.msra.mxu0 %v3454_v56  ;;  %1904 = vmatpush1.bf16.msra.mxu1 %v3457_v57  ;;  %v3544_v56 = vld [vmem:[#allocation2 + $0x740] ss:$16 sps:$4 sm:$0xff]   ;;  %v3547_v57 = vld [vmem:[#allocation2 + $0x748] ss:$16 sps:$4 sm:$0xff]  }
  0xd5   :  { %1741 = vmatprep.subr.bf16.mxu0 %v3462_v58  ;;  %1905 = vmatprep.subr.bf16.mxu1 %v3465_v59  ;;  %v3552_v58 = vld [vmem:[#allocation2 + $0x764] ss:$16 sps:$4 sm:$0xff]   ;;  %v3555_v59 = vld [vmem:[#allocation2 + $0x76c] ss:$16 sps:$4 sm:$0xff]  }
  0xd8   :  { %1742 = vmatpush1.bf16.msra.mxu0 %v3460_v60  ;;  %1906 = vmatpush1.bf16.msra.mxu1 %v3463_v61  ;;  %v3550_v60 = vld [vmem:[#allocation2 + $0x760] ss:$16 sps:$4 sm:$0xff]   ;;  %v3553_v61 = vld [vmem:[#allocation2 + $0x768] ss:$16 sps:$4 sm:$0xff]  }
  0xd9   :  { %1743 = vmatprep.subr.bf16.mxu0 %v3468_v62  ;;  %1907 = vmatprep.subr.bf16.mxu1 %v3471_v63  ;;  %v3558_v62 = vld [vmem:[#allocation2 + $0x784] ss:$16 sps:$4 sm:$0xff]   ;;  %v3561_v63 = vld [vmem:[#allocation2 + $0x78c] ss:$16 sps:$4 sm:$0xff]  }
  0xdc   :  { %1744 = vmatpush1.bf16.msra.mxu0 %v3466_v0  ;;  %1908 = vmatpush1.bf16.msra.mxu1 %v3469_v1  ;;  %v3556_v0 = vld [vmem:[#allocation2 + $0x780] ss:$16 sps:$4 sm:$0xff]   ;;  %v3559_v1 = vld [vmem:[#allocation2 + $0x788] ss:$16 sps:$4 sm:$0xff]  }
  0xdd   :  { %1745 = vmatprep.subr.bf16.mxu0 %v3474_v2  ;;  %1909 = vmatprep.subr.bf16.mxu1 %v3477_v3  ;;  %v3564_v2 = vld [vmem:[#allocation2 + $0x7a4] ss:$16 sps:$4 sm:$0xff]   ;;  %v3567_v3 = vld [vmem:[#allocation2 + $0x7ac] ss:$16 sps:$4 sm:$0xff]  }
  0xe0   :  { %1746 = vmatpush1.bf16.msra.mxu0 %v3472_v4  ;;  %1910 = vmatpush1.bf16.msra.mxu1 %v3475_v5  ;;  %v3562_v4 = vld [vmem:[#allocation2 + $0x7a0] ss:$16 sps:$4 sm:$0xff]   ;;  %v3565_v5 = vld [vmem:[#allocation2 + $0x7a8] ss:$16 sps:$4 sm:$0xff]  }
  0xe1   :  { %1747 = vmatprep.subr.bf16.mxu0 %v3480_v6  ;;  %1911 = vmatprep.subr.bf16.mxu1 %v3483_v7  ;;  %v3570_v6 = vld [vmem:[#allocation2 + $0x7c4] ss:$16 sps:$4 sm:$0xff]   ;;  %v3573_v7 = vld [vmem:[#allocation2 + $0x7cc] ss:$16 sps:$4 sm:$0xff]  }
  0xe4   :  { %1748 = vmatpush1.bf16.msra.mxu0 %v3478_v8  ;;  %1912 = vmatpush1.bf16.msra.mxu1 %v3481_v9  ;;  %v3568_v8 = vld [vmem:[#allocation2 + $0x7c0] ss:$16 sps:$4 sm:$0xff]   ;;  %v3571_v9 = vld [vmem:[#allocation2 + $0x7c8] ss:$16 sps:$4 sm:$0xff]  }
  0xe5   :  { %1758 = vmatprep.subr.bf16.mxu0 %v3486_v10  ;;  %1922 = vmatprep.subr.bf16.mxu1 %v3489_v12  ;;  %v3576_v10 = vld [vmem:[#allocation2 + $0x7e4] ss:$16 sps:$4 sm:$0xff]   ;;  %v3574_v12 = vld [vmem:[#allocation2 + $0x7e0] ss:$16 sps:$4 sm:$0xff]  }
  0xe7   :  { %1750 = vmatmul.mubr.bf16.vlgmr.msra.gmra.mrb[0].mxu0 %v73_v15  ;;  %1914 = vmatmul.mubr.bf16.vlgmr.msra.gmra.mrb[0].mxu1 %v73_v15  ;;  %v3582_v15 = vld [vmem:[#allocation4 + $0x4] ss:$8 sps:$4 sm:$0xff]  }
  0xe8   :  { %1759 = vmatpush1.bf16.msra.mxu0 %v3484_v13  ;;  %1923 = vmatpush1.bf16.msra.mxu1 %v3487_v14  ;;  %v3577_v13 = vld [vmem:[#allocation2 + $0x7e8] ss:$16 sps:$4 sm:$0xff]   ;;  %v67_v14 = vld [vmem:[%s3968_s0 + $0x30] sm:$0xff] }
  0xe9   :  { %1760 = vmatprep.subr.bf16.mxu0 %v3492_v16  ;;  %1924 = vmatprep.subr.bf16.mxu1 %v3495_v18  ;;  %v75_v16 = vpack.c.bf16 %v67_v14, %v67_v14  ;;  %v3585_v18 = vld [vmem:[#allocation4 + $0x14] ss:$8 sps:$4 sm:$0xff]  }
  0xea   :  { %1790 = vmatprep.mubr.bf16.mxu0 %v76_v21  ;;  %1954 = vmatprep.mubr.bf16.mxu1 %v76_v21  ;;  %v3586_v21 = vld [vmem:[#allocation4 + $0x20] ss:$8 sps:$4 sm:$0xff]  }
  0xec   :  { %1761 = vmatpush1.bf16.msra.mxu0 %v3490_v19  ;;  %1925 = vmatpush1.bf16.msra.mxu1 %v3493_v20  ;;  %v3583_v19 = vld [vmem:[#allocation4 + $0x10] ss:$8 sps:$4 sm:$0xff]   ;;  %v3588_v20 = vld [vmem:[#allocation4 + $0x24] ss:$8 sps:$4 sm:$0xff]  }
  0xed   :  { %1762 = vmatprep.subr.bf16.mxu0 %v3498_v22  ;;  %1926 = vmatprep.subr.bf16.mxu1 %v3501_v23  ;;  %v3591_v22 = vld [vmem:[#allocation4 + $0x34] ss:$8 sps:$4 sm:$0xff]   ;;  %v3589_v23 = vld [vmem:[#allocation4 + $0x30] ss:$8 sps:$4 sm:$0xff]  }
  0xf0   :  { %1763 = vmatpush1.bf16.msra.mxu0 %v3496_v24  ;;  %1927 = vmatpush1.bf16.msra.mxu1 %v3499_v25  ;;  %v3594_v24 = vld [vmem:[#allocation4 + $0x44] ss:$8 sps:$4 sm:$0xff]   ;;  %v3592_v25 = vld [vmem:[#allocation4 + $0x40] ss:$8 sps:$4 sm:$0xff]  }
  0xf1   :  { %1764 = vmatprep.subr.bf16.mxu0 %v3504_v26  ;;  %1928 = vmatprep.subr.bf16.mxu1 %v3507_v27  ;;  %v3597_v26 = vld [vmem:[#allocation4 + $0x54] ss:$8 sps:$4 sm:$0xff]   ;;  %v3595_v27 = vld [vmem:[#allocation4 + $0x50] ss:$8 sps:$4 sm:$0xff]  }
  0xf4   :  { %1765 = vmatpush1.bf16.msra.mxu0 %v3502_v28  ;;  %1929 = vmatpush1.bf16.msra.mxu1 %v3505_v29  ;;  %v3600_v28 = vld [vmem:[#allocation4 + $0x64] ss:$8 sps:$4 sm:$0xff]   ;;  %v3598_v29 = vld [vmem:[#allocation4 + $0x60] ss:$8 sps:$4 sm:$0xff]  }
  0xf5   :  { %1766 = vmatprep.subr.bf16.mxu0 %v3510_v30  ;;  %1930 = vmatprep.subr.bf16.mxu1 %v3513_v31  ;;  %v3603_v30 = vld [vmem:[#allocation4 + $0x74] ss:$8 sps:$4 sm:$0xff]   ;;  %v3601_v31 = vld [vmem:[#allocation4 + $0x70] ss:$8 sps:$4 sm:$0xff]  }
  0xf8   :  { %1767 = vmatpush1.bf16.msra.mxu0 %v3508_v32  ;;  %1931 = vmatpush1.bf16.msra.mxu1 %v3511_v33  ;;  %v3606_v32 = vld [vmem:[#allocation4 + $0x84] ss:$8 sps:$4 sm:$0xff]   ;;  %v3604_v33 = vld [vmem:[#allocation4 + $0x80] ss:$8 sps:$4 sm:$0xff]  }
  0xf9   :  { %1768 = vmatprep.subr.bf16.mxu0 %v3516_v34  ;;  %1932 = vmatprep.subr.bf16.mxu1 %v3519_v35  ;;  %v3609_v34 = vld [vmem:[#allocation4 + $0x94] ss:$8 sps:$4 sm:$0xff]   ;;  %v3607_v35 = vld [vmem:[#allocation4 + $0x90] ss:$8 sps:$4 sm:$0xff]  }
  0xfc   :  { %1769 = vmatpush1.bf16.msra.mxu0 %v3514_v36  ;;  %1933 = vmatpush1.bf16.msra.mxu1 %v3517_v37  ;;  %v3612_v36 = vld [vmem:[#allocation4 + $0xa4] ss:$8 sps:$4 sm:$0xff]   ;;  %v3610_v37 = vld [vmem:[#allocation4 + $0xa0] ss:$8 sps:$4 sm:$0xff]  }
  0xfd   :  { %1770 = vmatprep.subr.bf16.mxu0 %v3522_v38  ;;  %1934 = vmatprep.subr.bf16.mxu1 %v3525_v39  ;;  %v3615_v38 = vld [vmem:[#allocation4 + $0xb4] ss:$8 sps:$4 sm:$0xff]   ;;  %v3613_v39 = vld [vmem:[#allocation4 + $0xb0] ss:$8 sps:$4 sm:$0xff]  }
 0x100   :  { %1771 = vmatpush1.bf16.msra.mxu0 %v3520_v40  ;;  %1935 = vmatpush1.bf16.msra.mxu1 %v3523_v41  ;;  %v3618_v40 = vld [vmem:[#allocation4 + $0xc4] ss:$8 sps:$4 sm:$0xff]   ;;  %v3616_v41 = vld [vmem:[#allocation4 + $0xc0] ss:$8 sps:$4 sm:$0xff]  }
 0x101   :  { %1772 = vmatprep.subr.bf16.mxu0 %v3528_v42  ;;  %1936 = vmatprep.subr.bf16.mxu1 %v3531_v43  ;;  %v3621_v42 = vld [vmem:[#allocation4 + $0xd4] ss:$8 sps:$4 sm:$0xff]   ;;  %v3619_v43 = vld [vmem:[#allocation4 + $0xd0] ss:$8 sps:$4 sm:$0xff]  }
 0x104   :  { %1773 = vmatpush1.bf16.msra.mxu0 %v3526_v44  ;;  %1937 = vmatpush1.bf16.msra.mxu1 %v3529_v45  ;;  %v3624_v44 = vld [vmem:[#allocation4 + $0xe4] ss:$8 sps:$4 sm:$0xff]   ;;  %v3622_v45 = vld [vmem:[#allocation4 + $0xe0] ss:$8 sps:$4 sm:$0xff]  }
 0x105   :  { %1774 = vmatprep.subr.bf16.mxu0 %v3534_v46  ;;  %1938 = vmatprep.subr.bf16.mxu1 %v3537_v47  ;;  %v3627_v46 = vld [vmem:[#allocation4 + $0xf4] ss:$8 sps:$4 sm:$0xff]   ;;  %v3625_v47 = vld [vmem:[#allocation4 + $0xf0] ss:$8 sps:$4 sm:$0xff]  }
 0x108   :  { %1775 = vmatpush1.bf16.msra.mxu0 %v3532_v48  ;;  %1939 = vmatpush1.bf16.msra.mxu1 %v3535_v49  ;;  %v3630_v48 = vld [vmem:[#allocation4 + $0x104] ss:$8 sps:$4 sm:$0xff]  }
 0x109   :  { %1776 = vmatprep.subr.bf16.mxu0 %v3540_v50  ;;  %1940 = vmatprep.subr.bf16.mxu1 %v3543_v51  ;;  %v3676_v49 = vld [vmem:[%s3973_s5 + $0x40] sm:$0xff]   ;;  %v3678_v51 = vld [vmem:[%s3973_s5 + $0x48] sm:$0xff]  }
 0x10a   :  { %v3677_v50 = vld [vmem:[%s3973_s5] sm:$0xff]  }
 0x10c   :  { %1777 = vmatpush1.bf16.msra.mxu0 %v3538_v52  ;;  %1941 = vmatpush1.bf16.msra.mxu1 %v3541_v53  ;;  %v3679_v52 = vld [vmem:[%s3973_s5 + $0x8] sm:$0xff]   ;;  %v3680_v53 = vld [vmem:[%s3973_s5 + $0x50] sm:$0xff]  }
 0x10d   :  { %1778 = vmatprep.subr.bf16.mxu0 %v3546_v54  ;;  %1942 = vmatprep.subr.bf16.mxu1 %v3549_v55  ;;  %v3681_v54 = vld [vmem:[%s3973_s5 + $0x10] sm:$0xff]   ;;  %v3682_v55 = vld [vmem:[%s3973_s5 + $0x58] sm:$0xff]  }
 0x110   :  { %1779 = vmatpush1.bf16.msra.mxu0 %v3544_v56  ;;  %1943 = vmatpush1.bf16.msra.mxu1 %v3547_v57  ;;  %v3683_v56 = vld [vmem:[%s3973_s5 + $0x18] sm:$0xff]   ;;  %v3684_v57 = vld [vmem:[%s3973_s5 + $0x60] sm:$0xff]  }
 0x111   :  { %1780 = vmatprep.subr.bf16.mxu0 %v3552_v58  ;;  %1944 = vmatprep.subr.bf16.mxu1 %v3555_v59  ;;  %v3685_v58 = vld [vmem:[%s3973_s5 + $0x20] sm:$0xff]   ;;  %v3686_v59 = vld [vmem:[%s3973_s5 + $0x68] sm:$0xff]  }
 0x114   :  { %1781 = vmatpush1.bf16.msra.mxu0 %v3550_v60  ;;  %1945 = vmatpush1.bf16.msra.mxu1 %v3553_v61  ;;  %v3687_v60 = vld [vmem:[%s3973_s5 + $0x28] sm:$0xff]   ;;  %v335_v61 = vlaneseq }
 0x115   :  { %1782 = vmatprep.subr.bf16.mxu0 %v3558_v62  ;;  %1946 = vmatprep.subr.bf16.mxu1 %v3561_v63 }
 0x116   :  { %v3894_v62 = vshrl.u32 %v335_v61, 7  ;;  %v3690_v61 = vld [vmem:[%s3973_s5 + $0x78] sm:$0xff]  }
 0x118   :  { %1783 = vmatpush1.bf16.msra.mxu0 %v3556_v0  ;;  %1947 = vmatpush1.bf16.msra.mxu1 %v3559_v1  ;;  %v337_v63 = vsub.s32 0, %v3894_v62  ;;  %v3900_v0 = vld [vmem:[%s3970_s2] sm:$0xf]  ;;  %v341_v1 = vsub.s32 1, %v3894_v62 }
 0x119   :  { %1784 = vmatprep.subr.bf16.mxu0 %v3564_v2  ;;  %1948 = vmatprep.subr.bf16.mxu1 %v3567_v3  ;;  %v349_v2 = vsub.s32 3, %v3894_v62 }
 0x11a   :  { %v338_v3 = vrot.slane %v3900_v0, %v337_v63 }
 0x11c   :  { %1785 = vmatpush1.bf16.msra.mxu0 %v3562_v4  ;;  %1949 = vmatpush1.bf16.msra.mxu1 %v3565_v5  ;;  %v342_v4 = vrot.slane %v3900_v0, %v341_v1  ;;  %v350_v5 = vrot.slane %v3900_v0, %v349_v2  ;;  %v3758_v2 = vmov 0.0  }
 0x11d   :  { %1786 = vmatprep.subr.bf16.mxu0 %v3570_v6  ;;  %1950 = vmatprep.subr.bf16.mxu1 %v3573_v7 }
 0x120   :  { %1787 = vmatpush1.bf16.msra.mxu0 %v3568_v8  ;;  %1951 = vmatpush1.bf16.msra.mxu1 %v3571_v9 }
 0x121   :  { %1788 = vmatprep.subr.bf16.mxu0 %v3576_v10  ;;  %1952 = vmatprep.subr.bf16.mxu1 %v3579_v11 }
 0x124   :  { %1789 = vmatpush1.bf16.msra.mxu0 %v3574_v12  ;;  %1953 = vmatpush1.bf16.msra.mxu1 %v3577_v13 }
 0x125   :  { %2367 = vmatprep.subr.bf16.mxu0 %v3582_v15  ;;  %3103 = vmatprep.subr.bf16.mxu1 %v3676_v49  ;;  %v3669_v49 = vld [vmem:[#allocation4 + $0x1d4] ss:$8 sps:$4 sm:$0xff]  }
 0x127   :  { %1791 = vmatmul.mubr.bf16.vlgmr.msra.gmra.mrb[0].mxu0 %v75_v16  ;;  %1955 = vmatmul.mubr.bf16.vlgmr.msra.gmra.mrb[0].mxu1 %v75_v16 }
 0x128   :  { %2368 = vmatpush1.bf16.msra.mxu0 %v3580_v17  ;;  %3104 = vmatpush3.bf16.msra.mxu1 %v3677_v50  ;;  %v3667_v50 = vld [vmem:[#allocation4 + $0x1d0] ss:$8 sps:$4 sm:$0xff]  }
 0x129   :  { %2369 = vmatprep.subr.bf16.mxu0 %v3585_v18  ;;  %3105 = vmatprep.subr.bf16.mxu1 %v3678_v51 }
 0x12c   :  { %2370 = vmatpush1.bf16.msra.mxu0 %v3583_v19  ;;  %3106 = vmatpush3.bf16.msra.mxu1 %v3679_v52  ;;  %v3672_v52 = vld [vmem:[#allocation4 + $0x1e4] ss:$8 sps:$4 sm:$0xff]  }
 0x12d   :  { %2371 = vmatprep.subr.bf16.mxu0 %v3588_v20  ;;  %3107 = vmatprep.subr.bf16.mxu1 %v3680_v53  ;;  %v3670_v53 = vld [vmem:[#allocation4 + $0x1e0] ss:$8 sps:$4 sm:$0xff]  }
 0x130   :  { %2372 = vmatpush1.bf16.msra.mxu0 %v3586_v21  ;;  %3108 = vmatpush3.bf16.msra.mxu1 %v3681_v54  ;;  %v3628_v21 = vld [vmem:[#allocation4 + $0x100] ss:$8 sps:$4 sm:$0xff]  }
 0x131   :  { %2373 = vmatprep.subr.bf16.mxu0 %v3591_v22  ;;  %3109 = vmatprep.subr.bf16.mxu1 %v3682_v55  ;;  %v3675_v55 = vld [vmem:[#allocation4 + $0x1f4] ss:$8 sps:$4 sm:$0xff]  }
 0x134   :  { %2374 = vmatpush1.bf16.msra.mxu0 %v3589_v23  ;;  %3110 = vmatpush3.bf16.msra.mxu1 %v3683_v56  ;;  %v3633_v23 = vld [vmem:[#allocation4 + $0x114] ss:$8 sps:$4 sm:$0xff]   ;;  %v3673_v56 = vld [vmem:[#allocation4 + $0x1f0] ss:$8 sps:$4 sm:$0xff]  }
 0x135   :  { %2375 = vmatprep.subr.bf16.mxu0 %v3594_v24  ;;  %3111 = vmatprep.subr.bf16.mxu1 %v3684_v57 }
 0x138   :  { %2376 = vmatpush1.bf16.msra.mxu0 %v3592_v25  ;;  %3112 = vmatpush3.bf16.msra.mxu1 %v3685_v58  ;;  %v3631_v25 = vld [vmem:[#allocation4 + $0x110] ss:$8 sps:$4 sm:$0xff]  }
 0x139   :  { %2377 = vmatprep.subr.bf16.mxu0 %v3597_v26  ;;  %3113 = vmatprep.subr.bf16.mxu1 %v3686_v59  ;;  %v3636_v26 = vld [vmem:[#allocation4 + $0x124] ss:$8 sps:$4 sm:$0xff]   ;;  %v3688_v59 = vld [vmem:[%s3973_s5 + $0x70] sm:$0xff]  }
 0x13c   :  { %2378 = vmatpush1.bf16.msra.mxu0 %v3595_v27  ;;  %3114 = vmatpush3.bf16.msra.mxu1 %v3687_v60  ;;  %v3634_v27 = vld [vmem:[#allocation4 + $0x120] ss:$8 sps:$4 sm:$0xff]   ;;  %v3689_v60 = vld [vmem:[%s3973_s5 + $0x30] sm:$0xff]  }
 0x13d   :  { %2379 = vmatprep.subr.bf16.mxu0 %v3600_v28  ;;  %v3639_v28 = vld [vmem:[#allocation4 + $0x134] ss:$8 sps:$4 sm:$0xff]   ;;  %3115 = vmatprep.subr.bf16.mxu1 %v3688_v59 }
 0x140   :  { %2380 = vmatpush1.bf16.msra.mxu0 %v3598_v29  ;;  %v3637_v29 = vld [vmem:[#allocation4 + $0x130] ss:$8 sps:$4 sm:$0xff]   ;;  %3116 = vmatpush3.bf16.msra.mxu1 %v3689_v60 }
 0x141   :  { %2381 = vmatprep.subr.bf16.mxu0 %v3603_v30  ;;  %v3642_v30 = vld [vmem:[#allocation4 + $0x144] ss:$8 sps:$4 sm:$0xff]   ;;  %3117 = vmatprep.subr.bf16.mxu1 %v3690_v61 }
 0x144   :  { %2382 = vmatpush1.bf16.msra.mxu0 %v3601_v31  ;;  %v3640_v31 = vld [vmem:[#allocation4 + $0x140] ss:$8 sps:$4 sm:$0xff]  }
 0x145   :  { %2383 = vmatprep.subr.bf16.mxu0 %v3606_v32  ;;  %v3645_v32 = vld [vmem:[#allocation4 + $0x154] ss:$8 sps:$4 sm:$0xff]  }
 0x148   :  { %2384 = vmatpush1.bf16.msra.mxu0 %v3604_v33  ;;  %v3643_v33 = vld [vmem:[#allocation4 + $0x150] ss:$8 sps:$4 sm:$0xff]  }
 0x149   :  { %2385 = vmatprep.subr.bf16.mxu0 %v3609_v34  ;;  %v3648_v34 = vld [vmem:[#allocation4 + $0x164] ss:$8 sps:$4 sm:$0xff]  }
 0x14c   :  { %2386 = vmatpush1.bf16.msra.mxu0 %v3607_v35  ;;  %v3646_v35 = vld [vmem:[#allocation4 + $0x160] ss:$8 sps:$4 sm:$0xff]  }
 0x14d   :  { %2387 = vmatprep.subr.bf16.mxu0 %v3612_v36  ;;  %v3651_v36 = vld [vmem:[#allocation4 + $0x174] ss:$8 sps:$4 sm:$0xff]  }
 0x150   :  { %2388 = vmatpush1.bf16.msra.mxu0 %v3610_v37  ;;  %v3649_v37 = vld [vmem:[#allocation4 + $0x170] ss:$8 sps:$4 sm:$0xff]  }
 0x151   :  { %2389 = vmatprep.subr.bf16.mxu0 %v3615_v38  ;;  %v3654_v38 = vld [vmem:[#allocation4 + $0x184] ss:$8 sps:$4 sm:$0xff]  }
 0x154   :  { %2390 = vmatpush1.bf16.msra.mxu0 %v3613_v39  ;;  %v3652_v39 = vld [vmem:[#allocation4 + $0x180] ss:$8 sps:$4 sm:$0xff]  }
 0x155   :  { %2391 = vmatprep.subr.bf16.mxu0 %v3618_v40  ;;  %v3657_v40 = vld [vmem:[#allocation4 + $0x194] ss:$8 sps:$4 sm:$0xff]  }
 0x158   :  { %2392 = vmatpush1.bf16.msra.mxu0 %v3616_v41  ;;  %v3655_v41 = vld [vmem:[#allocation4 + $0x190] ss:$8 sps:$4 sm:$0xff]  }
 0x159   :  { %2393 = vmatprep.subr.bf16.mxu0 %v3621_v42  ;;  %v3660_v42 = vld [vmem:[#allocation4 + $0x1a4] ss:$8 sps:$4 sm:$0xff]  }
 0x15c   :  { %2394 = vmatpush1.bf16.msra.mxu0 %v3619_v43  ;;  %v3658_v43 = vld [vmem:[#allocation4 + $0x1a0] ss:$8 sps:$4 sm:$0xff]  }
 0x15d   :  { %2395 = vmatprep.subr.bf16.mxu0 %v3624_v44  ;;  %v3663_v44 = vld [vmem:[#allocation4 + $0x1b4] ss:$8 sps:$4 sm:$0xff]  }
 0x160   :  { %2396 = vmatpush1.bf16.msra.mxu0 %v3622_v45  ;;  %v3661_v45 = vld [vmem:[#allocation4 + $0x1b0] ss:$8 sps:$4 sm:$0xff]  }
 0x161   :  { %2397 = vmatprep.subr.bf16.mxu0 %v3627_v46  ;;  %v3666_v46 = vld [vmem:[#allocation4 + $0x1c4] ss:$8 sps:$4 sm:$0xff]  }
 0x164   :  { %2398 = vmatpush1.bf16.msra.mxu0 %v3625_v47  ;;  %v3664_v47 = vld [vmem:[#allocation4 + $0x1c0] ss:$8 sps:$4 sm:$0xff]  }
 0x165   :  { %2408 = vmatprep.subr.bf16.mxu0 %v3630_v48  ;;  %v345_v48 = vsub.s32 2, %v3894_v62  ;;  %v3693_v62 = vld [vmem:[%s3975_s7 + $0x8] sm:$0xff]  }
 0x167   :  { %v346_v51 = vrot.slane %v3900_v0, %v345_v48  ;;  %v3691_v0 = vld [vmem:[%s3973_s5 + $0x38] sm:$0xff]  }
 0x168   :  { %3118 = vmatpush3.bf16.msra.mxu1 %v3691_v0 }
 0x169   :  { %3134 = vmatprep.subr.bf16.mxu1 %v3758_v2 }
 0x1fa   :  { %v1792_v6 = vpop.f32.mrb[0].mxu0  ;;  %v3911_v7 = vpop.f32.mrb[0].mxu1 }
 0x1fb   :  { %v3154_v8 = vadd.f32 %v1792_v6, %v338_v3  ;;  %v1794_v9 = vpop.f32.mrb[1].mxu0  ;;  %v1958_v10 = vpop.f32.mrb[1].mxu1  ;;  %v3156_v54 = vadd.f32 %v3911_v7, %v346_v51  ;;  %v2035_v3 = vld [vmem:[%s3972_s4] sm:$0x3] }
 0x1fc   :  { %v3155_v11 = vadd.f32 %v1794_v9, %v342_v4  ;;  %v3157_v12 = vadd.f32 %v1958_v10, %v350_v5  ;;  %v1796_v13 = vpop.f32.mrb[2].mxu0  ;;  %v1960_v14 = vpop.f32.mrb[2].mxu1  ;;  %v2040_v4 = vrot.slane %v2035_v3, %v337_v63  ;;  %v2044_v5 = vrot.slane %v2035_v3, %v341_v1  ;;  %v3694_v63 = vld [vmem:[%s3975_s7 + $0x10] sm:$0xff]   ;;  %v3695_v1 = vld [vmem:[%s3975_s7 + $0x18] sm:$0xff]  }
 0x1fd   :  { %v1963_v15 = vmax.f32 %v3154_v8, 0.0  ;;  %v1797_v16 = vpop.f32.mrb[3].mxu0  ;;  %v1961_v17 = vpop.f32.mrb[3].mxu1  ;;  %v1965_v57 = vmax.f32 %v3156_v54, 0.0 }
 0x1fe   :  { %v1964_v18 = vmax.f32 %v3155_v11, 0.0  ;;  %v1966_v19 = vmax.f32 %v3157_v12, 0.0  ;;  %v3696_v17 = vld [vmem:[%s3975_s7 + $0x20] sm:$0xff]  }
 0x1ff   :  { %v1967_v22 = vpack.c.bf16 %v1963_v15, %v1963_v15  ;;  %v1969_v58 = vpack.c.bf16 %v1965_v57, %v1965_v57  ;;  %v3692_v15 = vld [vmem:[%s3975_s7] sm:$0xff]  }
 0x200   :  { %v1968_v20 = vpack.c.bf16 %v1964_v18, %v1964_v18  ;;  %v1970_v24 = vpack.c.bf16 %v1966_v19, %v1966_v19  ;;  %v3697_v18 = vld [vmem:[%s3975_s7 + $0x28] sm:$0xff]   ;;  %v3698_v19 = vld [vmem:[%s3975_s7 + $0x30] sm:$0xff]  }
 0x202   :  { %2399 = vmatprep.mubr.bf16.mxu0 %v1968_v20  ;;  %v3699_v20 = vld [vmem:[%s3975_s7 + $0x38] sm:$0xff]  }
 0x203   :  { %2400 = vmatmul.mubr.bf16.vlgmr.msra.gmra.mrb[4].mxu0 %v1967_v22  ;;  %v3077_v22 = vld [vmem:[%s3974_s6] ss:$0 sm:$0xff] }
 0x204   :  { %2409 = vmatpush1.bf16.msra.mxu0 %v3628_v21  ;;  %2440 = vmatprep.mubr.bf16.mxu0 %v1970_v24 }
 0x205   :  { %2410 = vmatprep.subr.bf16.mxu0 %v3633_v23 }
 0x208   :  { %2411 = vmatpush1.bf16.msra.mxu0 %v3631_v25 }
 0x209   :  { %2412 = vmatprep.subr.bf16.mxu0 %v3636_v26 }
 0x20c   :  { %2413 = vmatpush1.bf16.msra.mxu0 %v3634_v27 }
 0x20d   :  { %2414 = vmatprep.subr.bf16.mxu0 %v3639_v28 }
 0x210   :  { %2415 = vmatpush1.bf16.msra.mxu0 %v3637_v29 }
 0x211   :  { %2416 = vmatprep.subr.bf16.mxu0 %v3642_v30  ;;  %v3094_v30 = vld [vmem:[%s3976_s8] ss:$0 sm:$0xff] }
 0x214   :  { %2417 = vmatpush1.bf16.msra.mxu0 %v3640_v31 }
 0x215   :  { %2418 = vmatprep.subr.bf16.mxu0 %v3645_v32 }
 0x218   :  { %2419 = vmatpush1.bf16.msra.mxu0 %v3643_v33 }
 0x219   :  { %2420 = vmatprep.subr.bf16.mxu0 %v3648_v34 }
 0x21c   :  { %2421 = vmatpush1.bf16.msra.mxu0 %v3646_v35 }
 0x21d   :  { %2422 = vmatprep.subr.bf16.mxu0 %v3651_v36 }
 0x220   :  { %2423 = vmatpush1.bf16.msra.mxu0 %v3649_v37 }
 0x221   :  { %2424 = vmatprep.subr.bf16.mxu0 %v3654_v38 }
 0x224   :  { %2425 = vmatpush1.bf16.msra.mxu0 %v3652_v39 }
 0x225   :  { %2426 = vmatprep.subr.bf16.mxu0 %v3657_v40 }
 0x228   :  { %2427 = vmatpush1.bf16.msra.mxu0 %v3655_v41 }
 0x229   :  { %2428 = vmatprep.subr.bf16.mxu0 %v3660_v42 }
 0x22c   :  { %2429 = vmatpush1.bf16.msra.mxu0 %v3658_v43 }
 0x22d   :  { %2430 = vmatprep.subr.bf16.mxu0 %v3663_v44 }
 0x230   :  { %2431 = vmatpush1.bf16.msra.mxu0 %v3661_v45 }
 0x231   :  { %2432 = vmatprep.subr.bf16.mxu0 %v3666_v46 }
 0x234   :  { %2433 = vmatpush1.bf16.msra.mxu0 %v3664_v47 }
 0x235   :  { %2434 = vmatprep.subr.bf16.mxu0 %v3669_v49 }
 0x238   :  { %2435 = vmatpush1.bf16.msra.mxu0 %v3667_v50 }
 0x239   :  { %2436 = vmatprep.subr.bf16.mxu0 %v3672_v52 }
 0x23c   :  { %2437 = vmatpush1.bf16.msra.mxu0 %v3670_v53 }
 0x23d   :  { %2438 = vmatprep.subr.bf16.mxu0 %v3675_v55 }
 0x240   :  { %2439 = vmatpush1.bf16.msra.mxu0 %v3673_v56 }
 0x243   :  { %2441 = vmatmul.mubr.bf16.vlgmr.msra.gmra.mrb[4].mxu0 %v1969_v58 }
 0x316   :  { %v2442_v6 = vpop.f32.mrb[4].mxu0 }
 0x317   :  { %v3158_v7 = vadd.f32 %v2442_v6, %v2040_v4  ;;  %v2444_v8 = vpop.f32.mrb[5].mxu0 }
 0x318   :  { %v3159_v9 = vadd.f32 %v2444_v8, %v2044_v5  ;;  %v2446_v10 = vpop.f32.mrb[6].mxu0 }
 0x319   :  { %v2449_v11 = vmax.f32 %v3158_v7, 0.0  ;;  %v2447_v12 = vpop.f32.mrb[7].mxu0 }
 0x31a   :  { %v2450_v13 = vmax.f32 %v3159_v9, 0.0 }
 0x31b   :  { %v2451_v16 = vpack.c.bf16 %v2449_v11, %v2449_v11 }
 0x31c   :  { %v2452_v14 = vpack.c.bf16 %v2450_v13, %v2450_v13 }
 0x31e   :  { %2620 = vmatprep.mubr.bf16.mxu1 %v2452_v14 }
 0x31f   :  { %2621 = vmatmul.mubr.bf16.vlgmr.msra.gmra.mrb[4].mxu1 %v2451_v16 }
 0x320   :  { %3135 = vmatpush3.bf16.msra.mxu1 %v3692_v15  ;;  %3150 = vmatprep.mubr.msk.bf16.mxu1 %vm3759_vm0, %v3758_v2 }
 0x321   :  { %3136 = vmatprep.subr.bf16.mxu1 %v3758_v2 }
 0x324   :  { %3137 = vmatpush3.bf16.msra.mxu1 %v3693_v62 }
 0x325   :  { %3138 = vmatprep.subr.bf16.mxu1 %v3758_v2 }
 0x328   :  { %3139 = vmatpush3.bf16.msra.mxu1 %v3694_v63 }
 0x329   :  { %3140 = vmatprep.subr.bf16.mxu1 %v3758_v2 }
 0x32c   :  { %3141 = vmatpush3.bf16.msra.mxu1 %v3695_v1 }
 0x32d   :  { %3142 = vmatprep.subr.bf16.mxu1 %v3758_v2 }
 0x330   :  { %3143 = vmatpush3.bf16.msra.mxu1 %v3696_v17 }
 0x331   :  { %3144 = vmatprep.subr.bf16.mxu1 %v3758_v2 }
 0x334   :  { %3145 = vmatpush3.bf16.msra.mxu1 %v3697_v18 }
 0x335   :  { %3146 = vmatprep.subr.bf16.mxu1 %v3758_v2 }
 0x338   :  { %3147 = vmatpush3.bf16.msra.mxu1 %v3698_v19 }
 0x339   :  { %3148 = vmatprep.subr.bf16.mxu1 %v3758_v2 }
 0x33c   :  { %3149 = vmatpush3.bf16.msra.mxu1 %v3699_v20 }
 0x3f2   :  { %v3119_v21 = vpop.f32.mrb[4].mxu1 }
 0x3f3   :  { %v3120_v23 = vpop.f32.mrb[5].mxu1 }
 0x3f4   :  { %v3121_v24 = vadd.f32 %v3120_v23, %v3119_v21  ;;  %v3122_v25 = vpop.f32.mrb[6].mxu1 }
 0x3f5   :  { %v3123_v26 = vpop.f32.mrb[7].mxu1 }
 0x3f6   :  { %v2623_v27 = vadd.f32 %v3121_v24, %v3077_v22 }
 0x3f8   :  { %v2628_v28 = vmax.f32 %v2623_v27, 0.0 }
 0x3fa   :  { %v2629_v29 = vpack.c.bf16 %v2628_v28, %v2628_v28 }
 0x3fc   :  { %3151 = vmatmul.mubr.bf16.vlgmr.msra.gmra.mrb[8].mxu1 %v2629_v29 }
 0x4cf   :  { %v2735_v31 = vpop.f32.mrb[8].mxu1 }
 0x4d0   :  { %v2736_v32 = vadd.f32 %v3094_v30, %v2735_v31  ;;  %v3152_v33 = vpop.f32.mrb[9].mxu1 }
 0x4d1   :  { %v2738_v34 = vpop.f32.mrb[10].mxu1 }
 0x4d2   :  { %2741 = vmax.xlane.f32.xlu0 %v2736_v32  ;;  %v3153_v35 = vpop.f32.mrb[11].mxu1 }
 0x55f   :  { %v2742_v36 = vpop.xlane.xlu0 %2741 }
 0x560   :  { %v2743_v37 = vsub.f32 %v2736_v32, %v2742_v36 }
 0x562   :  { %v2744_v38 = vmul.f32 1.442695, %v2743_v37 }
 0x564   :  { %3700 = vpow2.f32 %v2744_v38 }
 0x56e   :  { %v3701_v39 = vpop.eup %3700 }
 0x56f   :  { %2746 = vadd.xlane.f32.xlu0 %v3701_v39 }
 0x5fc   :  { %v2747_v40 = vpop.xlane.xlu0 %2746 }
 0x5fd   :  { %3702 = vrcp.f32 %v2747_v40 }
 0x607   :  { %v3703_v41 = vpop.eup %3702 }
 0x608   :  { %v2749_v42 = vmul.f32 %v3703_v41, %v3701_v39 }
 0x60a   :  { %2750 = vst [vmem:[%s3977_s9] sm:$0xff] %v2749_v42 }
 0x60b   :  { %2755 = vsyncpa [#allocation3], 1 }
 0x60c   :  { %2756 = vsyncpa [#allocation5], 1 }

</bundles_post_ra>
